<compile_context>
chip_gen: v7x
topology: tpu7x:2x2x1
jax: 0.10.0
libtpu: 0.0.40
codegen_flags: <defaults>
</compile_context>

<pallas_src>
import functools

import jax
import jax.numpy as jnp
from jax.experimental import pallas as pl
from jax.experimental.pallas import tpu as pltpu


# Images per grid step: gives sublane-dense (8, feat_dim) output stores and
# multiplies the conv-matmul M dimension.
_TB = 8


def _round_up(x, m):
    return (x + m - 1) // m * m


def _vmem_budgets():
    """(per-buffer patch-block budget, vmem_limit_bytes), generation aware."""
    try:
        cap = int(pltpu.get_tpu_info().vmem_capacity_bytes)
    except Exception:  # pragma: no cover - conservative fallback
        cap = 64 * 1024 * 1024
    if cap >= 100 * 1024 * 1024:        # v5e / v6e: 128 MiB physical VMEM
        return 8 * 1024 * 1024, 96 * 1024 * 1024
    # v7x: 64 MiB physical VMEM -> smaller double-buffered block + limit.
    return 4 * 1024 * 1024, 48 * 1024 * 1024


def _pick_tiling(batch, hw, ck, per_buf_budget):
    """Static tiling: batch pad, hw tile rows, core split, padded extents."""
    b_pad = _round_up(max(batch, 1), _TB)
    nb = b_pad // _TB
    bytes_per_row = _TB * ck * 2                      # bf16 patch row, batch tile
    max_rows = max(8, (per_buf_budget // bytes_per_row) // 8 * 8)
    hw_tile = min(_round_up(hw, 8), max_rows)
    # v7x megacore: with a single batch tile, split the HW reduction across
    # the two TensorCores (cheap / no-op on single-core chips).
    if nb == 1 and hw > 8:
        hw_tile = min(hw_tile, max(8, _round_up(pl.cdiv(hw, 2), 8)))
    nh = pl.cdiv(hw, hw_tile)
    n_split = 2 if (nb == 1 and nh >= 2) else 1
    nh_half = pl.cdiv(nh, n_split)
    hw_pad = n_split * nh_half * hw_tile
    return b_pad, nb, hw_tile, n_split, nh_half, hw_pad


# ----------------------------------------------------------------------------
# Pallas kernel: fused conv(as matmul) + bias + ReLU + GAP accumulate (+ FC)
# ----------------------------------------------------------------------------
def _backbone_kernel(patches_ref, wconv_ref, bconv_ref, wfc_ref, out_ref,
                     acc_ref, *, tb, hw_tile, hw_total, ck, cout_pad,
                     nh_half, mask_rows):
    # patches_ref : (tb, hw_tile, ck=9*Cin)  bf16  im2col rows (NOT K-padded)
    # wconv_ref   : (ck, cout_pad)           bf16
    # bconv_ref   : (1, cout_pad)            f32
    # wfc_ref     : (cout_pad, feat_dim)     bf16
    # out_ref     : (tb, feat_dim)           f32   partial (per core-split) FC
    # acc_ref     : (tb, cout_pad)           f32   GAP accumulator scratch
    h = pl.program_id(2)

    @pl.when(h == 0)
    def _init():
        acc_ref[...] = jnp.zeros_like(acc_ref)

    # Conv-as-matmul over all tb*hw_tile spatial rows of this tile.
    # K = 9*Cin = 36 is fed directly; the MXU pads the contraction internally
    # so there is no reason to burn HBM bandwidth padding it to 128.
    p = patches_ref[...].reshape(tb * hw_tile, ck)
    conv = jnp.dot(p, wconv_ref[...], preferred_element_type=jnp.float32)
    conv = jnp.maximum(conv + bconv_ref[...], 0.0)
    conv = conv.reshape(tb, hw_tile, cout_pad)

    if mask_rows:
        # Zero padded spatial rows (their ReLU(bias) must not reach the GAP).
        base = (pl.program_id(0) * nh_half + h) * hw_tile
        row = base + jax.lax.broadcasted_iota(
            jnp.int32, (tb, hw_tile, cout_pad), 1)
        conv = jnp.where(row < hw_total, conv, 0.0)

    # Partial global-average-pool: per-image channel sums for this hw tile.
    acc_ref[...] += jnp.sum(conv, axis=1)

    @pl.when(h == pl.num_programs(2) - 1)
    def _finalize():
        pooled = acc_ref[...] * (1.0 / hw_total)               # (tb, cout_pad)
        feat = jnp.dot(pooled.astype(wfc_ref.dtype), wfc_ref[...],
                       preferred_element_type=jnp.float32)     # (tb, feat_dim)
        out_ref[...] = feat.astype(out_ref.dtype)


def _im2col_3x3_same(x_nhwc):
    """3x3 same-padded patches; patch index ordering = k*Cin + c, k = di*3+dj."""
    B, H, W, C = x_nhwc.shape
    xp = jnp.pad(x_nhwc, ((0, 0), (1, 1), (1, 1), (0, 0)))
    cols = []
    for di in range(3):
        for dj in range(3):
            cols.append(xp[:, di:di + H, dj:dj + W, :])
    patches = jnp.stack(cols, axis=3)                  # (B, H, W, 9, C)
    return patches.reshape(B, H * W, 9 * C)


@functools.partial(
    jax.jit,
    static_argnames=("feat_dim", "b_pad", "hw_tile", "n_split", "nh_half",
                     "hw_pad", "vmem_limit"))
def _forward_impl(x_nchw, params, *, feat_dim, b_pad, hw_tile, n_split,
                  nh_half, hw_pad, vmem_limit):
    B, Cin, H, W = x_nchw.shape
    HW = H * W
    Cout = params["wconv"].shape[0]
    ck = 9 * Cin
    cout_pad = _round_up(Cout, 128)
    nb = b_pad // _TB

    # ---- host-side glue (XLA): layout, im2col, bf16 cast, zero pads ----
    # TODO(synk): for very large inputs, build the 3x3 patches inside the
    # kernel from a streamed NHWC row band (removes the 9x im2col HBM
    # inflation); kept host-side here to keep Mosaic lowering simple.
    x_nhwc = jnp.transpose(x_nchw, (0, 2, 3, 1))                 # NCHW -> NHWC
    patches = _im2col_3x3_same(x_nhwc).astype(jnp.bfloat16)      # (B, HW, 36)
    patches = jnp.pad(patches, ((0, b_pad - B), (0, hw_pad - HW), (0, 0)))

    # Conv weight (Cout, Cin, 3, 3) -> (3, 3, Cin, Cout) -> (9*Cin, Cout),
    # matching the im2col ordering; only Cout (the lane axis) is padded.
    wconv_t = jnp.transpose(params["wconv"], (2, 3, 1, 0)).reshape(ck, Cout)
    wconv_t = jnp.pad(wconv_t, ((0, 0), (0, cout_pad - Cout)))
    wconv_t = wconv_t.astype(jnp.bfloat16)
    bconv = jnp.pad(params["bconv"], (0, cout_pad - Cout))
    bconv = bconv.reshape(1, cout_pad).astype(jnp.float32)
    wfc = jnp.pad(params["wfc"], ((0, cout_pad - Cout), (0, 0)))
    wfc = wfc.astype(jnp.bfloat16)

    kernel = functools.partial(
        _backbone_kernel, tb=_TB, hw_tile=hw_tile, hw_total=HW, ck=ck,
        cout_pad=cout_pad, nh_half=nh_half, mask_rows=(hw_pad != HW))

    flops = 2 * b_pad * HW * ck * Cout + 2 * b_pad * Cout * feat_dim
    bytes_accessed = (patches.size * 2 + wconv_t.size * 2 + wfc.size * 2
                      + bconv.size * 4 + n_split * b_pad * feat_dim * 4)

    partial_feats = pl.pallas_call(
        kernel,
        out_shape=jax.ShapeDtypeStruct((n_split, b_pad, feat_dim), jnp.float32),
        grid_spec=pltpu.PrefetchScalarGridSpec(
            num_scalar_prefetch=0,
            grid=(n_split, nb, nh_half),
            in_specs=[
                pl.BlockSpec((_TB, hw_tile, ck),
                             lambda c, b, h: (b, c * nh_half + h, 0)),
                pl.BlockSpec((ck, cout_pad), lambda c, b, h: (0, 0)),
                pl.BlockSpec((1, cout_pad), lambda c, b, h: (0, 0)),
                pl.BlockSpec((cout_pad, feat_dim), lambda c, b, h: (0, 0)),
            ],
            out_specs=pl.BlockSpec((None, _TB, feat_dim),
                                   lambda c, b, h: (c, b, 0)),
            scratch_shapes=[pltpu.VMEM((_TB, cout_pad), jnp.float32)],
        ),
        compiler_params=pltpu.CompilerParams(
            dimension_semantics=("parallel", "parallel", "arbitrary"),
            vmem_limit_bytes=vmem_limit),
        cost_estimate=pl.CostEstimate(flops=flops, transcendentals=0,
                                      bytes_accessed=bytes_accessed),
    )(patches, wconv_t, bconv, wfc)

    # FC is linear, so per-core-split partials just add; bias added once here.
    out = jnp.sum(partial_feats, axis=0) + params["bfc"][None, :].astype(jnp.float32)
    return out[:B]


def elasticface_forward(x_nchw, params, feat_dim=512):
    """ElasticFace.forward(x) == backbone(x).  x is NCHW float32."""
    B, Cin, H, W = x_nchw.shape
    HW = H * W
    ck = 9 * Cin
    per_buf, vmem_limit = _vmem_budgets()
    b_pad, _, hw_tile, n_split, nh_half, hw_pad = _pick_tiling(
        B, HW, ck, per_buf)
    return _forward_impl(x_nchw, params, feat_dim=feat_dim, b_pad=b_pad,
                         hw_tile=hw_tile, n_split=n_split, nh_half=nh_half,
                         hw_pad=hw_pad, vmem_limit=vmem_limit)


def _reference_forward(x_nchw, params, feat_dim=512):
    """Pure-JAX reference with matching bf16-input / f32-accum precision."""
    B, Cin, H, W = x_nchw.shape
    x_nhwc = jnp.transpose(x_nchw, (0, 2, 3, 1))
    patches = _im2col_3x3_same(x_nhwc).astype(jnp.bfloat16)
    wconv_t = jnp.transpose(params["wconv"], (2, 3, 1, 0)).reshape(9 * Cin, -1)
    conv = jnp.dot(patches, wconv_t.astype(jnp.bfloat16),
                   preferred_element_type=jnp.float32)
    conv = jnp.maximum(conv + params["bconv"][None, None, :], 0.0)
    pooled = jnp.mean(conv, axis=1)                              # (B, Cout) f32
    feat = jnp.dot(pooled.astype(jnp.bfloat16),
                   params["wfc"].astype(jnp.bfloat16),
                   preferred_element_type=jnp.float32)
    return feat + params["bfc"][None, :]


def init_params(key, c_in, c_out, feat_dim):
    k1, k2, k3, k4 = jax.random.split(key, 4)
    return {
        "wconv": jax.random.normal(k1, (c_out, c_in, 3, 3), jnp.float32) * 0.1,
        "bconv": jax.random.normal(k2, (c_out,), jnp.float32) * 0.01,
        "wfc": jax.random.normal(k3, (c_out, feat_dim), jnp.float32) * 0.05,
        "bfc": jax.random.normal(k4, (feat_dim,), jnp.float32) * 0.01,
    }


if __name__ == "__main__":
    # TODO(synk): ElasticFace's s/m margin head and `label` arg are unused in
    # the reference forward (training-loss only), so they are not implemented.
    key = jax.random.PRNGKey(0)
    kx, kp = jax.random.split(key)

    B, Cin, H, W = 2, 4, 16, 16
    Cout, feat_dim = 32, 512

    x = jax.random.normal(kx, (B, Cin, H, W), jnp.float32)       # NCHW input
    params = init_params(kp, Cin, Cout, feat_dim)

    out = elasticface_forward(x, params, feat_dim=feat_dim)
    out = jax.block_until_ready(out)

    ref = _reference_forward(x, params, feat_dim=feat_dim)
    assert out.shape == (B, feat_dim)
    max_err = float(jnp.max(jnp.abs(out - ref)))
    assert jnp.allclose(out, ref, atol=5e-3, rtol=5e-3), max_err

    print("KERNEL_OK")
</pallas_src>

<mosaic_0001>
module attributes {stable_mosaic.version = 11 : i64} {
  func.func @_backbone_kernel(%arg0: i32, %arg1: i32, %arg2: i32, %arg3: memref<8x128x36xbf16, #tpu.memory_space<vmem>>, %arg4: memref<36x128xbf16, #tpu.memory_space<vmem>>, %arg5: memref<1x128xf32, #tpu.memory_space<vmem>>, %arg6: memref<128x512xbf16, #tpu.memory_space<vmem>>, %arg7: memref<1x8x512xf32, #tpu.memory_space<vmem>>, %arg8: memref<8x128xf32, #tpu.memory_space<vmem>>) attributes {dimension_semantics = [#tpu.dimension_semantics<parallel>, #tpu.dimension_semantics<parallel>, #tpu.dimension_semantics<arbitrary>], iteration_bounds = array<i64: 2, 1, 1>, scalar_prefetch = 0 : i64, scratch_operands = 1 : i64, tpu.core_type = #tpu.core_type<tc>, window_params = [{transform_indices = @transform_0, window_bounds = array<i64: 8, 128, 36>}, {pipeline_mode = #tpu.pipeline_mode<synchronous>, transform_indices = @transform_1, window_bounds = array<i64: 36, 128>}, {pipeline_mode = #tpu.pipeline_mode<synchronous>, transform_indices = @transform_2, window_bounds = array<i64: 1, 128>}, {pipeline_mode = #tpu.pipeline_mode<synchronous>, transform_indices = @transform_3, window_bounds = array<i64: 128, 512>}, {transform_indices = @transform_4, window_bounds = array<i64: 1, 8, 512>}]} {
    %c0_i32 = arith.constant 0 : i32
    %0 = arith.cmpi eq, %arg2, %c0_i32 : i32
    %1 = arith.extui %0 : i1 to i32
    %c0_i32_0 = arith.constant 0 : i32
    %2 = arith.cmpi ne, %1, %c0_i32_0 : i32
    scf.if %2 {
      %cst_15 = arith.constant 0.000000e+00 : f32
      %20 = vector.broadcast %cst_15 : f32 to vector<8x128xf32>
      %c0_16 = arith.constant 0 : index
      %c0_17 = arith.constant 0 : index
      %21 = vector.load %arg8[%c0_16, %c0_17] : memref<8x128xf32, #tpu.memory_space<vmem>>, vector<8x128xf32>
      tpu.vector_store %arg8[%c0_16, %c0_17], %20 {strides = array<i32>} : memref<8x128xf32, #tpu.memory_space<vmem>>, vector<8x128xf32>,
    } else {
    }
    %c0 = arith.constant 0 : index
    %c0_1 = arith.constant 0 : index
    %c0_2 = arith.constant 0 : index
    %3 = vector.load %arg3[%c0, %c0_1, %c0_2] : memref<8x128x36xbf16, #tpu.memory_space<vmem>>, vector<8x128x36xbf16>
    %4 = vector.shape_cast %3 : vector<8x128x36xbf16> to vector<1024x36xbf16>
    %c0_3 = arith.constant 0 : index
    %c0_4 = arith.constant 0 : index
    %5 = vector.load %arg4[%c0_3, %c0_4] : memref<36x128xbf16, #tpu.memory_space<vmem>>, vector<36x128xbf16>
    %cst = arith.constant dense<0.000000e+00> : vector<1024x128xf32>
    %6 = tpu.matmul %4, %5, %cst {dimension_numbers = #tpu.dot_dimension_numbers<[1], [0], [0], [1], [0, 0, 1, 1], [], []>} : vector<1024x36xbf16>, vector<36x128xbf16>, vector<1024x128xf32> -> vector<1024x128xf32>
    %c0_5 = arith.constant 0 : index
    %c0_6 = arith.constant 0 : index
    %7 = vector.load %arg5[%c0_5, %c0_6] : memref<1x128xf32, #tpu.memory_space<vmem>>, vector<1x128xf32>
    %8 = vector.broadcast %7 : vector<1x128xf32> to vector<1024x128xf32>
    %9 = arith.addf %6, %8 : vector<1024x128xf32>
    %cst_7 = arith.constant 0.000000e+00 : f32
    %10 = vector.broadcast %cst_7 : f32 to vector<1024x128xf32>
    %11 = arith.maximumf %9, %10 : vector<1024x128xf32>
    %12 = vector.shape_cast %11 : vector<1024x128xf32> to vector<8x128x128xf32>
    %c0_8 = arith.constant 0 : index
    %c0_9 = arith.constant 0 : index
    %13 = vector.load %arg8[%c0_8, %c0_9] : memref<8x128xf32, #tpu.memory_space<vmem>>, vector<8x128xf32>
    %cst_10 = arith.constant dense<0.000000e+00> : vector<8x128xf32>
    %14 = vector.multi_reduction <add>, %12, %cst_10 [1] : vector<8x128x128xf32> to vector<8x128xf32>
    %15 = arith.addf %13, %14 : vector<8x128xf32>
    %c0_11 = arith.constant 0 : index
    %c0_12 = arith.constant 0 : index
    %16 = vector.load %arg8[%c0_11, %c0_12] : memref<8x128xf32, #tpu.memory_space<vmem>>, vector<8x128xf32>
    tpu.vector_store %arg8[%c0_11, %c0_12], %15 {strides = array<i32>} : memref<8x128xf32, #tpu.memory_space<vmem>>, vector<8x128xf32>,
    %c0_i32_13 = arith.constant 0 : i32
    %17 = arith.cmpi eq, %arg2, %c0_i32_13 : i32
    %18 = arith.extui %17 : i1 to i32
    %c0_i32_14 = arith.constant 0 : i32
    %19 = arith.cmpi ne, %18, %c0_i32_14 : i32
    scf.if %19 {
      %c0_15 = arith.constant 0 : index
      %c0_16 = arith.constant 0 : index
      %20 = vector.load %arg8[%c0_15, %c0_16] : memref<8x128xf32, #tpu.memory_space<vmem>>, vector<8x128xf32>
      %cst_17 = arith.constant 3.906250e-03 : f32
      %21 = vector.broadcast %cst_17 : f32 to vector<8x128xf32>
      %22 = arith.mulf %20, %21 : vector<8x128xf32>
      %23 = arith.truncf %22 : vector<8x128xf32> to vector<8x128xbf16>
      %c0_18 = arith.constant 0 : index
      %c0_19 = arith.constant 0 : index
      %24 = vector.load %arg6[%c0_18, %c0_19] : memref<128x512xbf16, #tpu.memory_space<vmem>>, vector<128x512xbf16>
      %cst_20 = arith.constant dense<0.000000e+00> : vector<8x512xf32>
      %25 = tpu.matmul %23, %24, %cst_20 {dimension_numbers = #tpu.dot_dimension_numbers<[1], [0], [0], [1], [0, 0, 1, 1], [], []>} : vector<8x128xbf16>, vector<128x512xbf16>, vector<8x512xf32> -> vector<8x512xf32>
      %c0_21 = arith.constant 0 : index
      %c0_22 = arith.constant 0 : index
      %c0_23 = arith.constant 0 : index
      %26 = vector.load %arg7[%c0_21, %c0_22, %c0_23] : memref<1x8x512xf32, #tpu.memory_space<vmem>>, vector<1x8x512xf32>
      %27 = vector.shape_cast %26 : vector<1x8x512xf32> to vector<8x512xf32>
      %28 = vector.shape_cast %25 : vector<8x512xf32> to vector<1x8x512xf32>
      tpu.vector_store %arg7[%c0_21, %c0_22, %c0_23], %28 {strides = array<i32>} : memref<1x8x512xf32, #tpu.memory_space<vmem>>, vector<1x8x512xf32>,
    } else {
    }
    return
  }
  func.func @transform_0(%arg0: i32, %arg1: i32, %arg2: i32) -> (i32, i32, i32) {
    %c1_i32 = arith.constant 1 : i32
    %0 = arith.muli %arg0, %c1_i32 : i32
    %1 = arith.addi %0, %arg2 : i32
    %c0_i32 = arith.constant 0 : i32
    %c0_i32_0 = arith.constant 0 : i32
    return %arg1, %1, %c0_i32 : i32, i32, i32
  }
  func.func @transform_1(%arg0: i32, %arg1: i32, %arg2: i32) -> (i32, i32) {
    %c0_i32 = arith.constant 0 : i32
    %c0_i32_0 = arith.constant 0 : i32
    %c0_i32_1 = arith.constant 0 : i32
    return %c0_i32, %c0_i32_0 : i32, i32
  }
  func.func @transform_2(%arg0: i32, %arg1: i32, %arg2: i32) -> (i32, i32) {
    %c0_i32 = arith.constant 0 : i32
    %c0_i32_0 = arith.constant 0 : i32
    %c0_i32_1 = arith.constant 0 : i32
    return %c0_i32, %c0_i32_0 : i32, i32
  }
  func.func @transform_3(%arg0: i32, %arg1: i32, %arg2: i32) -> (i32, i32) {
    %c0_i32 = arith.constant 0 : i32
    %c0_i32_0 = arith.constant 0 : i32
    %c0_i32_1 = arith.constant 0 : i32
    return %c0_i32, %c0_i32_0 : i32, i32
  }
  func.func @transform_4(%arg0: i32, %arg1: i32, %arg2: i32) -> (i32, i32, i32) {
    %c0_i32 = arith.constant 0 : i32
    %c0_i32_0 = arith.constant 0 : i32
    return %arg0, %arg1, %c0_i32 : i32, i32, i32
  }
}

</mosaic_0001>

<bundles_post_ra>
// kernel: _forward_impl.1
= control target key start
LH: loop header
LB: loop body
LE: loop exit
PB: predicated region body
PF: predicated region fallthrough
CT: control target
= control target key end

     0   :  { %s3324_s15 = smov 0   ;;  %s3326_s16 = smov 0   ;;  %s3920_s0 = inlined_call_operand.vmem [shape: bf16[8,256,36], index: 0, kind: input, shape index: {}]   ;;  %s3921_s1 = inlined_call_operand.vmem [shape: bf16[36,128], index: 1, kind: input, shape index: {}]   ;;  %s3922_s2 = inlined_call_operand.vmem [shape: f32[1,128], index: 2, kind: input, shape index: {}]   ;;  %s3923_s3 = inlined_call_operand.vmem [shape: bf16[128,512], index: 3, kind: input, shape index: {}]   ;;  %s3924_s4 = inlined_call_operand.vmem [shape: f32[2,8,512], index: 4, kind: output, shape index: {}]  }
   0x1   :  { %s3328_s17 = smov 0   ;;  %s3330_s18 = smov 0  }
   0x2   :  { %s3332_s19 = smov 0  }
   0x3 LB: > { %s33_s20 = sadd.s32 1, %s3292_s18  ;;  %p51_p1 = scmp.ne.s32.totalorder %s3284_s16, %s3280_s15  ;;  %s3296_s19 = sphi %s3332_s19, %s14_s19   ;;  %s3292_s18 = sphi %s3330_s18, %s3928_s18   ;;  %s3288_s17 = sphi %s3328_s17, %s3927_s17   ;;  %s3284_s16 = sphi %s3326_s16, %s3926_s16   ;;  %s3280_s15 = sphi %s3324_s15, %s3925_s15  }
   0x4   : > { %p35_p0 = scmp.ge.s32.totalorder %s33_s20, 2  ;;  %p52_p2 = scmp.eq.s32.totalorder %s3296_s19, 0 }
   0x5   : > { %s44_s22 = sadd.s32 1, %s3284_s16  ;;  %p2716_p5 = scmp.ge.s32.totalorder %s3296_s19, 2 }
   0x6   : > { %s3930_s20 = smov (%p35_p0, %s33_s20), 0  ;;  %p53_p3 = por %p52_p2, %p51_p1 }
   0x7   : > { %s40_s21 = ssub.s32 %s3292_s18, %s3930_s20  ;;  %177 = sbr.rel (%p2716_p5) target bundleno = 50 (0x32), region = 28 }
   0x8   : > { %p42_p4 = scmp.eq.s32.totalorder %s40_s21, 0 }
   0xa   : > { %s3359_s23 = scalar_select %p42_p4, %s3284_s16, %s44_s22  }
   0xe   : > { %180 = sbr.rel (!%p53_p3) target bundleno = 50 (0x32), region = 32  ;;  %s182_s24 = sand.u32 (%p53_p3), 1, %s3284_s16  }
   0xf   : > { %s2890_s25 = sshll.u32 (%p53_p3), %s3292_s18, 6  ;;  %s2717_s26 = sshll.u32 (%p53_p3), %s182_s24, 9 }
  0x10   : > { %s3367_s29 = scalar_lea.vmem (%p53_p3), %s3920_s0, %s2890_s25  ;;  %s3372_s30 = scalar_lea.vmem (%p53_p3), [#allocation3], %s2717_s26 }
  0x11   : > { %v207_v0 = vld [vmem:[%s3367_s29] sm:$0xff] (%p53_p3)   ;;  %v211_v1 = vld [vmem:[%s3367_s29 + $0x8] sm:$0xff] (%p53_p3)   ;;  %v215_v2 = vld [vmem:[%s3367_s29 + $0x10] sm:$0xff] (%p53_p3)  }
  0x12   : > { %208 = vst [vmem:[%s3372_s30] sm:$0xff] (%p53_p3), %v207_v0   ;;  %212 = vst [vmem:[%s3372_s30 + $0x8] sm:$0xff] (%p53_p3), %v211_v1   ;;  %v219_v3 = vld [vmem:[%s3367_s29 + $0x18] sm:$0xff] (%p53_p3)   ;;  %v223_v4 = vld [vmem:[%s3367_s29 + $0x20] sm:$0xff] (%p53_p3)  }
  0x13   : > { %216 = vst [vmem:[%s3372_s30 + $0x10] sm:$0xff] (%p53_p3), %v215_v2   ;;  %v227_v5 = vld [vmem:[%s3367_s29 + $0x28] sm:$0xff] (%p53_p3)   ;;  %220 = vst [vmem:[%s3372_s30 + $0x18] sm:$0xff] (%p53_p3), %v219_v3   ;;  %v231_v6 = vld [vmem:[%s3367_s29 + $0x30] sm:$0xff] (%p53_p3)  }
  0x14   : > { %224 = vst [vmem:[%s3372_s30 + $0x20] sm:$0xff] (%p53_p3), %v223_v4   ;;  %228 = vst [vmem:[%s3372_s30 + $0x28] sm:$0xff] (%p53_p3), %v227_v5   ;;  %v235_v7 = vld [vmem:[%s3367_s29 + $0x38] sm:$0xff] (%p53_p3)   ;;  %v239_v8 = vld [vmem:[%s3367_s29 + $0x80] sm:$0xff] (%p53_p3)  }
  0x15   : > { %232 = vst [vmem:[%s3372_s30 + $0x30] sm:$0xff] %v231_v6   ;;  %236 = vst [vmem:[%s3372_s30 + $0x38] sm:$0xff] %v235_v7   ;;  %v243_v9 = vld [vmem:[%s3367_s29 + $0x88] sm:$0xff]   ;;  %v247_v10 = vld [vmem:[%s3367_s29 + $0x90] sm:$0xff]  }
  0x16   : > { %240 = vst [vmem:[%s3372_s30 + $0x40] sm:$0xff] %v239_v8   ;;  %v251_v11 = vld [vmem:[%s3367_s29 + $0x98] sm:$0xff]   ;;  %244 = vst [vmem:[%s3372_s30 + $0x48] sm:$0xff] %v243_v9   ;;  %v255_v12 = vld [vmem:[%s3367_s29 + $0xa0] sm:$0xff]  }
  0x17   : > { %248 = vst [vmem:[%s3372_s30 + $0x50] sm:$0xff] %v247_v10   ;;  %252 = vst [vmem:[%s3372_s30 + $0x58] sm:$0xff] %v251_v11   ;;  %v259_v13 = vld [vmem:[%s3367_s29 + $0xa8] sm:$0xff]   ;;  %v263_v14 = vld [vmem:[%s3367_s29 + $0xb0] sm:$0xff]  }
  0x18   : > { %256 = vst [vmem:[%s3372_s30 + $0x60] sm:$0xff] %v255_v12   ;;  %260 = vst [vmem:[%s3372_s30 + $0x68] sm:$0xff] %v259_v13   ;;  %v267_v15 = vld [vmem:[%s3367_s29 + $0xb8] sm:$0xff]   ;;  %v271_v16 = vld [vmem:[%s3367_s29 + $0x100] sm:$0xff]  }
  0x19   : > { %264 = vst [vmem:[%s3372_s30 + $0x70] sm:$0xff] %v263_v14   ;;  %v275_v17 = vld [vmem:[%s3367_s29 + $0x108] sm:$0xff]   ;;  %268 = vst [vmem:[%s3372_s30 + $0x78] sm:$0xff] %v267_v15   ;;  %v279_v18 = vld [vmem:[%s3367_s29 + $0x110] sm:$0xff]  }
  0x1a   : > { %272 = vst [vmem:[%s3372_s30 + $0x80] sm:$0xff] %v271_v16   ;;  %276 = vst [vmem:[%s3372_s30 + $0x88] sm:$0xff] %v275_v17   ;;  %v283_v19 = vld [vmem:[%s3367_s29 + $0x118] sm:$0xff]   ;;  %v287_v20 = vld [vmem:[%s3367_s29 + $0x120] sm:$0xff]  }
  0x1b   : > { %280 = vst [vmem:[%s3372_s30 + $0x90] sm:$0xff] %v279_v18   ;;  %284 = vst [vmem:[%s3372_s30 + $0x98] sm:$0xff] %v283_v19   ;;  %v291_v21 = vld [vmem:[%s3367_s29 + $0x128] sm:$0xff]   ;;  %v295_v22 = vld [vmem:[%s3367_s29 + $0x130] sm:$0xff]  }
  0x1c   : > { %288 = vst [vmem:[%s3372_s30 + $0xa0] sm:$0xff] %v287_v20   ;;  %v299_v23 = vld [vmem:[%s3367_s29 + $0x138] sm:$0xff]   ;;  %292 = vst [vmem:[%s3372_s30 + $0xa8] sm:$0xff] %v291_v21   ;;  %v303_v24 = vld [vmem:[%s3367_s29 + $0x180] sm:$0xff]  }
  0x1d   : > { %296 = vst [vmem:[%s3372_s30 + $0xb0] sm:$0xff] %v295_v22   ;;  %300 = vst [vmem:[%s3372_s30 + $0xb8] sm:$0xff] %v299_v23   ;;  %v307_v25 = vld [vmem:[%s3367_s29 + $0x188] sm:$0xff]   ;;  %v311_v26 = vld [vmem:[%s3367_s29 + $0x190] sm:$0xff]  }
  0x1e   : > { %304 = vst [vmem:[%s3372_s30 + $0xc0] sm:$0xff] %v303_v24   ;;  %308 = vst [vmem:[%s3372_s30 + $0xc8] sm:$0xff] %v307_v25   ;;  %v315_v27 = vld [vmem:[%s3367_s29 + $0x198] sm:$0xff]   ;;  %v319_v28 = vld [vmem:[%s3367_s29 + $0x1a0] sm:$0xff]  }
  0x1f   : > { %312 = vst [vmem:[%s3372_s30 + $0xd0] sm:$0xff] %v311_v26   ;;  %v323_v29 = vld [vmem:[%s3367_s29 + $0x1a8] sm:$0xff]   ;;  %316 = vst [vmem:[%s3372_s30 + $0xd8] sm:$0xff] %v315_v27   ;;  %v327_v30 = vld [vmem:[%s3367_s29 + $0x1b0] sm:$0xff]  }
  0x20   : > { %320 = vst [vmem:[%s3372_s30 + $0xe0] sm:$0xff] %v319_v28   ;;  %324 = vst [vmem:[%s3372_s30 + $0xe8] sm:$0xff] %v323_v29   ;;  %v331_v31 = vld [vmem:[%s3367_s29 + $0x1b8] sm:$0xff]   ;;  %v335_v32 = vld [vmem:[%s3367_s29 + $0x200] sm:$0xff]  }
  0x21   : > { %328 = vst [vmem:[%s3372_s30 + $0xf0] sm:$0xff] %v327_v30   ;;  %332 = vst [vmem:[%s3372_s30 + $0xf8] sm:$0xff] %v331_v31   ;;  %v339_v33 = vld [vmem:[%s3367_s29 + $0x208] sm:$0xff]   ;;  %v343_v34 = vld [vmem:[%s3367_s29 + $0x210] sm:$0xff]  }
  0x22   : > { %336 = vst [vmem:[%s3372_s30 + $0x100] sm:$0xff] %v335_v32   ;;  %v347_v35 = vld [vmem:[%s3367_s29 + $0x218] sm:$0xff]   ;;  %340 = vst [vmem:[%s3372_s30 + $0x108] sm:$0xff] %v339_v33   ;;  %v351_v36 = vld [vmem:[%s3367_s29 + $0x220] sm:$0xff]  }
  0x23   : > { %344 = vst [vmem:[%s3372_s30 + $0x110] sm:$0xff] %v343_v34   ;;  %348 = vst [vmem:[%s3372_s30 + $0x118] sm:$0xff] %v347_v35   ;;  %v355_v37 = vld [vmem:[%s3367_s29 + $0x228] sm:$0xff]   ;;  %v359_v38 = vld [vmem:[%s3367_s29 + $0x230] sm:$0xff]  }
  0x24   : > { %352 = vst [vmem:[%s3372_s30 + $0x120] sm:$0xff] %v351_v36   ;;  %356 = vst [vmem:[%s3372_s30 + $0x128] sm:$0xff] %v355_v37   ;;  %v363_v39 = vld [vmem:[%s3367_s29 + $0x238] sm:$0xff]   ;;  %v367_v40 = vld [vmem:[%s3367_s29 + $0x280] sm:$0xff]  }
  0x25   : > { %360 = vst [vmem:[%s3372_s30 + $0x130] sm:$0xff] %v359_v38   ;;  %v371_v41 = vld [vmem:[%s3367_s29 + $0x288] sm:$0xff]   ;;  %364 = vst [vmem:[%s3372_s30 + $0x138] sm:$0xff] %v363_v39   ;;  %v375_v42 = vld [vmem:[%s3367_s29 + $0x290] sm:$0xff]  }
  0x26   : > { %368 = vst [vmem:[%s3372_s30 + $0x140] sm:$0xff] %v367_v40   ;;  %372 = vst [vmem:[%s3372_s30 + $0x148] sm:$0xff] %v371_v41   ;;  %v379_v43 = vld [vmem:[%s3367_s29 + $0x298] sm:$0xff]   ;;  %v383_v44 = vld [vmem:[%s3367_s29 + $0x2a0] sm:$0xff]  }
  0x27   : > { %376 = vst [vmem:[%s3372_s30 + $0x150] sm:$0xff] %v375_v42   ;;  %380 = vst [vmem:[%s3372_s30 + $0x158] sm:$0xff] %v379_v43   ;;  %v387_v45 = vld [vmem:[%s3367_s29 + $0x2a8] sm:$0xff]   ;;  %v391_v46 = vld [vmem:[%s3367_s29 + $0x2b0] sm:$0xff]  }
  0x28   : > { %384 = vst [vmem:[%s3372_s30 + $0x160] sm:$0xff] %v383_v44   ;;  %v395_v47 = vld [vmem:[%s3367_s29 + $0x2b8] sm:$0xff]   ;;  %388 = vst [vmem:[%s3372_s30 + $0x168] sm:$0xff] %v387_v45   ;;  %v399_v48 = vld [vmem:[%s3367_s29 + $0x300] sm:$0xff]  }
  0x29   : > { %392 = vst [vmem:[%s3372_s30 + $0x170] sm:$0xff] %v391_v46   ;;  %396 = vst [vmem:[%s3372_s30 + $0x178] sm:$0xff] %v395_v47   ;;  %v403_v49 = vld [vmem:[%s3367_s29 + $0x308] sm:$0xff]   ;;  %v407_v50 = vld [vmem:[%s3367_s29 + $0x310] sm:$0xff]  }
  0x2a   : > { %400 = vst [vmem:[%s3372_s30 + $0x180] sm:$0xff] %v399_v48   ;;  %404 = vst [vmem:[%s3372_s30 + $0x188] sm:$0xff] %v403_v49   ;;  %v411_v51 = vld [vmem:[%s3367_s29 + $0x318] sm:$0xff]   ;;  %v415_v52 = vld [vmem:[%s3367_s29 + $0x320] sm:$0xff]  }
  0x2b   : > { %408 = vst [vmem:[%s3372_s30 + $0x190] sm:$0xff] %v407_v50   ;;  %v419_v53 = vld [vmem:[%s3367_s29 + $0x328] sm:$0xff]   ;;  %412 = vst [vmem:[%s3372_s30 + $0x198] sm:$0xff] %v411_v51   ;;  %v423_v54 = vld [vmem:[%s3367_s29 + $0x330] sm:$0xff]  }
  0x2c   : > { %416 = vst [vmem:[%s3372_s30 + $0x1a0] sm:$0xff] %v415_v52   ;;  %420 = vst [vmem:[%s3372_s30 + $0x1a8] sm:$0xff] %v419_v53   ;;  %v427_v55 = vld [vmem:[%s3367_s29 + $0x338] sm:$0xff]   ;;  %v431_v56 = vld [vmem:[%s3367_s29 + $0x380] sm:$0xff]  }
  0x2d   : > { %424 = vst [vmem:[%s3372_s30 + $0x1b0] sm:$0xff] %v423_v54   ;;  %428 = vst [vmem:[%s3372_s30 + $0x1b8] sm:$0xff] %v427_v55   ;;  %v435_v57 = vld [vmem:[%s3367_s29 + $0x388] sm:$0xff]   ;;  %v439_v58 = vld [vmem:[%s3367_s29 + $0x390] sm:$0xff]  }
  0x2e   : > { %432 = vst [vmem:[%s3372_s30 + $0x1c0] sm:$0xff] %v431_v56   ;;  %v443_v59 = vld [vmem:[%s3367_s29 + $0x398] sm:$0xff]   ;;  %436 = vst [vmem:[%s3372_s30 + $0x1c8] sm:$0xff] %v435_v57   ;;  %v447_v60 = vld [vmem:[%s3367_s29 + $0x3a0] sm:$0xff]  }
  0x2f   : > { %440 = vst [vmem:[%s3372_s30 + $0x1d0] sm:$0xff] %v439_v58   ;;  %444 = vst [vmem:[%s3372_s30 + $0x1d8] sm:$0xff] %v443_v59   ;;  %v451_v61 = vld [vmem:[%s3367_s29 + $0x3a8] sm:$0xff]   ;;  %v455_v62 = vld [vmem:[%s3367_s29 + $0x3b0] sm:$0xff]  }
  0x30   : > { %448 = vst [vmem:[%s3372_s30 + $0x1e0] sm:$0xff] %v447_v60   ;;  %452 = vst [vmem:[%s3372_s30 + $0x1e8] sm:$0xff] %v451_v61   ;;  %v459_v63 = vld [vmem:[%s3367_s29 + $0x3b8] sm:$0xff]  }
  0x31   : > { %456 = vst [vmem:[%s3372_s30 + $0x1f0] sm:$0xff] %v455_v62   ;;  %460 = vst [vmem:[%s3372_s30 + $0x1f8] sm:$0xff] %v459_v63  }
  0x32 PF: > { %p2720_p6 = scmp.ge.s32.totalorder %s3296_s19, 1  ;;  %p740_p7 = scmp.lt.s32.totalorder %s3296_s19, 3 }
  0x34   : > { %p741_p8 = pnand %p2720_p6, %p740_p7 }
  0x35   : > { %v3142_v0 = vld [vmem:[%s3921_s1] sm:$0xff] (!%p741_p8)   ;;  %v3143_v1 = vld [vmem:[%s3921_s1 + $0x8] sm:$0xff] (!%p741_p8)   ;;  %s747_s9 = sand.u32 (!%p741_p8), 1, %s3280_s15   ;;  %v3144_v2 = vld [vmem:[%s3921_s1 + $0x10] ss:$0 sps:$4 sm:$0x33] (!%p741_p8)  }
  0x36   : > { %744 = sbr.rel (%p741_p8) target bundleno = 710 (0x2c6), region = 73  ;;  %2959 = vmatprep.subr.bf16.mxu0 (!%p741_p8), %v3142_v0  ;;  %s2721_s12 = sshll.u32 (!%p741_p8), %s747_s9, 9  ;;  %3093 = vmatprep.subr.bf16.mxu1 (!%p741_p8), %v3142_v0  ;;  %vm1269_vm0 = vcmask (!%p741_p8), 293888   ;;  %vm1462_vm1 = vcmask (!%p741_p8), 1041408   ;;  %vm2316_vm2 = vcmask (!%p741_p8), 1041409   ;;  %vm2318_vm3 = vcmask (!%p741_p8), 1042434  }
  0x37   : > { %2960 = vmatpush3.bf16.msra.mxu0 (!%p741_p8), %v3142_v0  ;;  %3096 = vmatpush3.bf16.msra.mxu1 (!%p741_p8), %v3142_v0  ;;  %s3511_s13 = scalar_lea.vmem (!%p741_p8), [#allocation3], %s2721_s12  ;;  %v1464_v4 = vsel (!%p741_p8), %vm1462_vm1, %v3144_v2, 0  ;;  %vm2320_vm4 = vcmask (!%p741_p8), 1043459   ;;  %vm2322_vm5 = vcmask (!%p741_p8), 1044484   ;;  %vm2324_vm6 = vcmask (!%p741_p8), 1045509   ;;  %p779_p9 = scmp.lt.s32.totalorder (!%p741_p8), %s3288_s17, 1 }
  0x38   : > { %2961 = vmatprep.subr.bf16.mxu0 (!%p741_p8), %v3143_v1  ;;  %v3145_v3 = vld [vmem:[%s3511_s13] sm:$0xff] (!%p741_p8)   ;;  %3094 = vmatprep.subr.bf16.mxu1 (!%p741_p8), %v3143_v1  ;;  %v3146_v5 = vld [vmem:[%s3511_s13 + $0x8] sm:$0xff] (!%p741_p8)   ;;  %v3147_v6 = vld [vmem:[%s3511_s13 + $0x10] sm:$0xff] (!%p741_p8)   ;;  %vm2326_vm7 = vcmask (!%p741_p8), 1046534   ;;  %vm2328_vm8 = vcmask (!%p741_p8), 1047559  }
  0x39   : > { %2965 = vmatprep.mubr.msk.bf16.mxu0 (!%p741_p8), %vm1269_vm0, %v3145_v3  ;;  %v3157_v7 = vld [vmem:[%s3511_s13 + $0x130] sm:$0xff] (!%p741_p8)   ;;  %v3158_v8 = vld [vmem:[%s3511_s13 + $0x138] sm:$0xff] (!%p741_p8)   ;;  %v3149_v10 = vld [vmem:[%s3511_s13 + $0x20] sm:$0xff] (!%p741_p8)  }
  0x3a   : > { %v3148_v9 = vld [vmem:[%s3511_s13 + $0x18] sm:$0xff] (!%p741_p8)   ;;  %3041 = vmatprep.mubr.msk.bf16.mxu1 (!%p741_p8), %vm1269_vm0, %v3157_v7  ;;  %v3161_v11 = vld [vmem:[%s3511_s13 + $0x140] sm:$0xff] (!%p741_p8)   ;;  %v3162_v12 = vld [vmem:[%s3511_s13 + $0x148] sm:$0xff] (!%p741_p8)  }
  0x3b   : > { %2962 = vmatpush3.bf16.msra.mxu0 (!%p741_p8), %v3143_v1  ;;  %3097 = vmatpush3.bf16.msra.mxu1 (!%p741_p8), %v3143_v1  ;;  %v3165_v13 = vld [vmem:[%s3511_s13 + $0x150] sm:$0xff] (!%p741_p8)   ;;  %v3150_v14 = vld [vmem:[%s3511_s13 + $0x28] sm:$0xff] (!%p741_p8)   ;;  %v3166_v16 = vld [vmem:[%s3511_s13 + $0x158] sm:$0xff] (!%p741_p8)  }
  0x3c   : > { %3099 = vmatprep.subr.msk.bf16.mxu0 (!%p741_p8), %vm1462_vm1, %v3144_v2  ;;  %3100 = vmatprep.subr.msk.bf16.mxu1 (!%p741_p8), %vm1462_vm1, %v3144_v2  ;;  %v3151_v15 = vld [vmem:[%s3511_s13 + $0x30] sm:$0xff] (!%p741_p8)   ;;  %v3169_v17 = vld [vmem:[%s3511_s13 + $0x160] sm:$0xff] (!%p741_p8)   ;;  %v3152_v18 = vld [vmem:[%s3511_s13 + $0x38] sm:$0xff] (!%p741_p8)  }
  0x3d   : > { %v3153_v19 = vld [vmem:[%s3511_s13 + $0x40] sm:$0xff]   ;;  %v3170_v20 = vld [vmem:[%s3511_s13 + $0x168] sm:$0xff]   ;;  %v3173_v21 = vld [vmem:[%s3511_s13 + $0x170] sm:$0xff]   ;;  %s3932_s17 = smov (!%p779_p9, %s3288_s17), 1 }
  0x3e   : > { %v3154_v22 = vld [vmem:[%s3511_s13 + $0x48] sm:$0xff]   ;;  %v3155_v23 = vld [vmem:[%s3511_s13 + $0x50] sm:$0xff]   ;;  %v3174_v24 = vld [vmem:[%s3511_s13 + $0x178] sm:$0xff]   ;;  %s2891_s28 = sshll.u32 %s3932_s17, 5 }
  0x3f   : > { %2964 = vmatpush3.bf16.msra.mxu0 %v1464_v4  ;;  %3098 = vmatpush3.bf16.msra.mxu1 %v1464_v4  ;;  %v3177_v25 = vld [vmem:[%s3511_s13 + $0x180] sm:$0xff]   ;;  %v3156_v26 = vld [vmem:[%s3511_s13 + $0x58] sm:$0xff]   ;;  %v3178_v28 = vld [vmem:[%s3511_s13 + $0x188] sm:$0xff]   ;;  %s787_s5 = scalar_lea.vmem %s3924_s4, %s2891_s28 }
  0x40   : > { %v3159_v27 = vld [vmem:[%s3511_s13 + $0x60] sm:$0xff]   ;;  %v3181_v29 = vld [vmem:[%s3511_s13 + $0x190] sm:$0xff]   ;;  %v3160_v30 = vld [vmem:[%s3511_s13 + $0x68] sm:$0xff]  }
  0x41   : > { %v3163_v31 = vld [vmem:[%s3511_s13 + $0x70] sm:$0xff]   ;;  %v3182_v32 = vld [vmem:[%s3511_s13 + $0x198] sm:$0xff]   ;;  %v3185_v33 = vld [vmem:[%s3511_s13 + $0x1a0] sm:$0xff]  }
  0x42   : > { %2966 = vmatmul.mubr.msk.bf16.vlgmr.msra.gmra.mrb[0].mxu0 %vm1269_vm0, %v3146_v5  ;;  %3042 = vmatmul.mubr.msk.bf16.vlgmr.msra.gmra.mrb[0].mxu1 %vm1269_vm0, %v3158_v8  ;;  %v3164_v34 = vld [vmem:[%s3511_s13 + $0x78] sm:$0xff]   ;;  %v3167_v35 = vld [vmem:[%s3511_s13 + $0x80] sm:$0xff]   ;;  %v3186_v36 = vld [vmem:[%s3511_s13 + $0x1a8] sm:$0xff]  }
  0x43   : > { %2969 = vmatprep.mubr.msk.bf16.mxu0 %vm1269_vm0, %v3147_v6  ;;  %3045 = vmatprep.mubr.msk.bf16.mxu1 %vm1269_vm0, %v3161_v11  ;;  %v3189_v37 = vld [vmem:[%s3511_s13 + $0x1b0] sm:$0xff]   ;;  %v3168_v38 = vld [vmem:[%s3511_s13 + $0x88] sm:$0xff]   ;;  %v3190_v40 = vld [vmem:[%s3511_s13 + $0x1b8] sm:$0xff]  }
  0x44   : > { %v3171_v39 = vld [vmem:[%s3511_s13 + $0x90] sm:$0xff]   ;;  %v3193_v41 = vld [vmem:[%s3511_s13 + $0x1c0] sm:$0xff]   ;;  %v3172_v42 = vld [vmem:[%s3511_s13 + $0x98] sm:$0xff]  }
  0x45   : > { %v3175_v43 = vld [vmem:[%s3511_s13 + $0xa0] sm:$0xff]   ;;  %v3194_v44 = vld [vmem:[%s3511_s13 + $0x1c8] sm:$0xff]   ;;  %v3197_v45 = vld [vmem:[%s3511_s13 + $0x1d0] sm:$0xff]  }
  0x46   : > { %v3176_v46 = vld [vmem:[%s3511_s13 + $0xa8] sm:$0xff]   ;;  %v3179_v47 = vld [vmem:[%s3511_s13 + $0xb0] sm:$0xff]   ;;  %v3198_v48 = vld [vmem:[%s3511_s13 + $0x1d8] sm:$0xff]  }
  0x47   : > { %v3201_v49 = vld [vmem:[%s3511_s13 + $0x1e0] sm:$0xff]   ;;  %v3180_v50 = vld [vmem:[%s3511_s13 + $0xb8] sm:$0xff]   ;;  %v3202_v52 = vld [vmem:[%s3511_s13 + $0x1e8] sm:$0xff]  }
  0x48   : > { %v3183_v51 = vld [vmem:[%s3511_s13 + $0xc0] sm:$0xff]   ;;  %v3205_v53 = vld [vmem:[%s3511_s13 + $0x1f0] sm:$0xff]   ;;  %v3184_v54 = vld [vmem:[%s3511_s13 + $0xc8] sm:$0xff]  }
  0x49   : > { %v3187_v55 = vld [vmem:[%s3511_s13 + $0xd0] sm:$0xff]   ;;  %v3206_v56 = vld [vmem:[%s3511_s13 + $0x1f8] sm:$0xff]   ;;  %v3191_v58 = vld [vmem:[%s3511_s13 + $0xe0] sm:$0xff]  }
  0x4a   : > { %2970 = vmatmul.mubr.msk.bf16.gmra.mrb[4].mxu0 %vm1269_vm0, %v3148_v9  ;;  %3046 = vmatmul.mubr.msk.bf16.gmra.mrb[4].mxu1 %vm1269_vm0, %v3162_v12  ;;  %v3188_v57 = vld [vmem:[%s3511_s13 + $0xd8] sm:$0xff]   ;;  %v3192_v59 = vld [vmem:[%s3511_s13 + $0xe8] sm:$0xff]   ;;  %v3195_v60 = vld [vmem:[%s3511_s13 + $0xf0] sm:$0xff]  }
  0x4b   : > { %2973 = vmatprep.mubr.msk.bf16.mxu0 %vm1269_vm0, %v3149_v10  ;;  %3049 = vmatprep.mubr.msk.bf16.mxu1 %vm1269_vm0, %v3165_v13  ;;  %v3196_v61 = vld [vmem:[%s3511_s13 + $0xf8] sm:$0xff]   ;;  %v3199_v62 = vld [vmem:[%s3511_s13 + $0x100] sm:$0xff]   ;;  %v3200_v63 = vld [vmem:[%s3511_s13 + $0x108] sm:$0xff]  }
  0x4c   : > { %v3203_v0 = vld [vmem:[%s3511_s13 + $0x110] sm:$0xff]   ;;  %v3204_v1 = vld [vmem:[%s3511_s13 + $0x118] sm:$0xff]   ;;  %v3207_v2 = vld [vmem:[%s3511_s13 + $0x120] sm:$0xff]  }
  0x4d   : > { %v3208_v3 = vld [vmem:[%s3511_s13 + $0x128] sm:$0xff]   ;;  %v3209_v4 = vld [vmem:[%s3923_s3] ss:$16 sps:$4 sm:$0xff]   ;;  %v3211_v5 = vld [vmem:[%s3923_s3 + $0x4] ss:$16 sps:$4 sm:$0xff]  }
  0x4e   : > { %2531 = vmatprep.subr.bf16.mxu1 %v3211_v5  ;;  %v3212_v6 = vld [vmem:[%s3923_s3 + $0x20] ss:$16 sps:$4 sm:$0xff]   ;;  %v3214_v7 = vld [vmem:[%s3923_s3 + $0x24] ss:$16 sps:$4 sm:$0xff]  }
  0x4f   : > { %2532 = vmatpush1.bf16.msra.mxu1 %v3209_v4  ;;  %v3217_v8 = vld [vmem:[%s3923_s3 + $0x44] ss:$16 sps:$4 sm:$0xff]   ;;  %v3215_v9 = vld [vmem:[%s3923_s3 + $0x40] ss:$16 sps:$4 sm:$0xff]  }
  0x50   : > { %2533 = vmatprep.subr.bf16.mxu1 %v3214_v7  ;;  %v3218_v10 = vld [vmem:[%s3923_s3 + $0x60] ss:$16 sps:$4 sm:$0xff]   ;;  %v3220_v11 = vld [vmem:[%s3923_s3 + $0x64] ss:$16 sps:$4 sm:$0xff]  }
  0x51   : > { %v3668_v12 = vld [vmem:[%s3922_s2] ss:$0 sm:$0xff] }
  0x52   : > { %2974 = vmatmul.mubr.msk.bf16.gmra.mrb[8].mxu0 %vm1269_vm0, %v3150_v14  ;;  %3050 = vmatmul.mubr.msk.bf16.gmra.mrb[8].mxu1 %vm1269_vm0, %v3166_v16 }
  0x53   : > { %2977 = vmatprep.mubr.msk.bf16.mxu0 %vm1269_vm0, %v3151_v15  ;;  %3053 = vmatprep.mubr.msk.bf16.mxu1 %vm1269_vm0, %v3169_v17 }
  0x54   : > { %2534 = vmatpush1.bf16.msra.mxu1 %v3212_v6 }
  0x55   : > { %2535 = vmatprep.subr.bf16.mxu1 %v3217_v8 }
  0x58   : > { %2536 = vmatpush1.bf16.msra.mxu1 %v3215_v9 }
  0x59   : > { %2537 = vmatprep.subr.bf16.mxu1 %v3220_v11 }
  0x5a   : > { %2978 = vmatmul.mubr.msk.bf16.gmra.mrb[12].mxu0 %vm1269_vm0, %v3152_v18  ;;  %3054 = vmatmul.mubr.msk.bf16.gmra.mrb[12].mxu1 %vm1269_vm0, %v3170_v20 }
  0x5b   : > { %2981 = vmatprep.mubr.msk.bf16.mxu0 %vm1269_vm0, %v3153_v19  ;;  %3057 = vmatprep.mubr.msk.bf16.mxu1 %vm1269_vm0, %v3173_v21 }
  0x5c   : > { %2538 = vmatpush1.bf16.msra.mxu1 %v3218_v10 }
  0x62   : > { %2982 = vmatmul.mubr.msk.bf16.gmra.mrb[16].mxu0 %vm1269_vm0, %v3154_v22  ;;  %3058 = vmatmul.mubr.msk.bf16.gmra.mrb[16].mxu1 %vm1269_vm0, %v3174_v24 }
  0x63   : > { %2985 = vmatprep.mubr.msk.bf16.mxu0 %vm1269_vm0, %v3155_v23  ;;  %3061 = vmatprep.mubr.msk.bf16.mxu1 %vm1269_vm0, %v3177_v25 }
  0x6a   : > { %2986 = vmatmul.mubr.msk.bf16.gmra.mrb[20].mxu0 %vm1269_vm0, %v3156_v26  ;;  %3062 = vmatmul.mubr.msk.bf16.gmra.mrb[20].mxu1 %vm1269_vm0, %v3178_v28 }
  0x6b   : > { %2989 = vmatprep.mubr.msk.bf16.mxu0 %vm1269_vm0, %v3159_v27  ;;  %3065 = vmatprep.mubr.msk.bf16.mxu1 %vm1269_vm0, %v3181_v29 }
  0x72   : > { %2990 = vmatmul.mubr.msk.bf16.gmra.mrb[24].mxu0 %vm1269_vm0, %v3160_v30  ;;  %3066 = vmatmul.mubr.msk.bf16.gmra.mrb[24].mxu1 %vm1269_vm0, %v3182_v32 }
  0x73   : > { %2993 = vmatprep.mubr.msk.bf16.mxu0 %vm1269_vm0, %v3163_v31  ;;  %3069 = vmatprep.mubr.msk.bf16.mxu1 %vm1269_vm0, %v3185_v33 }
  0x7a   : > { %2994 = vmatmul.mubr.msk.bf16.gmra.mrb[28].mxu0 %vm1269_vm0, %v3164_v34  ;;  %3070 = vmatmul.mubr.msk.bf16.gmra.mrb[28].mxu1 %vm1269_vm0, %v3186_v36 }
  0x7b   : > { %2997 = vmatprep.mubr.msk.bf16.mxu0 %vm1269_vm0, %v3167_v35  ;;  %3073 = vmatprep.mubr.msk.bf16.mxu1 %vm1269_vm0, %v3189_v37 }
  0x82   : > { %2998 = vmatmul.mubr.msk.bf16.gmra.mrb[32].mxu0 %vm1269_vm0, %v3168_v38  ;;  %3074 = vmatmul.mubr.msk.bf16.gmra.mrb[32].mxu1 %vm1269_vm0, %v3190_v40 }
  0x83   : > { %3001 = vmatprep.mubr.msk.bf16.mxu0 %vm1269_vm0, %v3171_v39  ;;  %3077 = vmatprep.mubr.msk.bf16.mxu1 %vm1269_vm0, %v3193_v41 }
  0x8a   : > { %3002 = vmatmul.mubr.msk.bf16.gmra.mrb[36].mxu0 %vm1269_vm0, %v3172_v42  ;;  %3078 = vmatmul.mubr.msk.bf16.gmra.mrb[36].mxu1 %vm1269_vm0, %v3194_v44 }
  0x8b   : > { %3005 = vmatprep.mubr.msk.bf16.mxu0 %vm1269_vm0, %v3175_v43  ;;  %3081 = vmatprep.mubr.msk.bf16.mxu1 %vm1269_vm0, %v3197_v45 }
  0x92   : > { %3006 = vmatmul.mubr.msk.bf16.gmra.mrb[40].mxu0 %vm1269_vm0, %v3176_v46  ;;  %3082 = vmatmul.mubr.msk.bf16.gmra.mrb[40].mxu1 %vm1269_vm0, %v3198_v48 }
  0x93   : > { %3009 = vmatprep.mubr.msk.bf16.mxu0 %vm1269_vm0, %v3179_v47  ;;  %3085 = vmatprep.mubr.msk.bf16.mxu1 %vm1269_vm0, %v3201_v49 }
  0x9a   : > { %3010 = vmatmul.mubr.msk.bf16.gmra.mrb[44].mxu0 %vm1269_vm0, %v3180_v50  ;;  %3086 = vmatmul.mubr.msk.bf16.gmra.mrb[44].mxu1 %vm1269_vm0, %v3202_v52 }
  0x9b   : > { %3013 = vmatprep.mubr.msk.bf16.mxu0 %vm1269_vm0, %v3183_v51  ;;  %3089 = vmatprep.mubr.msk.bf16.mxu1 %vm1269_vm0, %v3205_v53 }
  0xa2   : > { %3014 = vmatmul.mubr.msk.bf16.gmra.mrb[48].mxu0 %vm1269_vm0, %v3184_v54  ;;  %3090 = vmatmul.mubr.msk.bf16.gmra.mrb[48].mxu1 %vm1269_vm0, %v3206_v56 }
  0xa3   : > { %3017 = vmatprep.mubr.msk.bf16.mxu0 %vm1269_vm0, %v3187_v55 }
  0xaa   : > { %3018 = vmatmul.mubr.msk.bf16.gmra.mrb[52].mxu0 %vm1269_vm0, %v3188_v57 }
  0xab   : > { %3021 = vmatprep.mubr.msk.bf16.mxu0 %vm1269_vm0, %v3191_v58 }
  0xb2   : > { %3022 = vmatmul.mubr.msk.bf16.gmra.mrb[56].mxu0 %vm1269_vm0, %v3192_v59 }
  0xb3   : > { %3025 = vmatprep.mubr.msk.bf16.mxu0 %vm1269_vm0, %v3195_v60  ;;  %v3221_v60 = vld [vmem:[%s3923_s3 + $0x80] ss:$16 sps:$4 sm:$0xff]  }
  0xba   : > { %3026 = vmatmul.mubr.msk.bf16.gmra.mrb[60].mxu0 %vm1269_vm0, %v3196_v61  ;;  %v3223_v61 = vld [vmem:[%s3923_s3 + $0x84] ss:$16 sps:$4 sm:$0xff]  }
  0xbb   : > { %3029 = vmatprep.mubr.msk.bf16.mxu0 %vm1269_vm0, %v3199_v62  ;;  %2539 = vmatprep.subr.bf16.mxu1 %v3223_v61 }
  0xbc   : > { %2540 = vmatpush1.bf16.msra.mxu1 %v3221_v60 }
  0xc2   : > { %3030 = vmatmul.mubr.msk.bf16.gmra.mrb[64].mxu0 %vm1269_vm0, %v3200_v63 }
  0xc3   : > { %3033 = vmatprep.mubr.msk.bf16.mxu0 %vm1269_vm0, %v3203_v0 }
  0xca   : > { %3034 = vmatmul.mubr.msk.bf16.gmra.mrb[68].mxu0 %vm1269_vm0, %v3204_v1 }
  0xcb   : > { %3037 = vmatprep.mubr.msk.bf16.mxu0 %vm1269_vm0, %v3207_v2 }
  0xd2   : > { %3038 = vmatmul.mubr.msk.bf16.gmra.mrb[72].mxu0 %vm1269_vm0, %v3208_v3 }
 0x115   : > { %v2967_v13 = vpop.f32.mrb[0].mxu0  ;;  %v3673_v20 = vpop.f32.mrb[0].mxu1 }
 0x116   : > { %v1500_v14 = vpop.f32.mrb[1].mxu0  ;;  %v1509_v18 = vadd.f32 %v2967_v13, %v3668_v12  ;;  %v3676_v24 = vpop.f32.mrb[1].mxu1  ;;  %v3224_v13 = vld [vmem:[%s3923_s3 + $0xa0] ss:$16 sps:$4 sm:$0xff]  }
 0x117   : > { %v1501_v15 = vadd.f32 %v3668_v12, %v1500_v14  ;;  %v2968_v16 = vpop.f32.mrb[2].mxu0  ;;  %v3678_v25 = vpop.f32.mrb[2].mxu1  ;;  %v3226_v14 = vld [vmem:[%s3923_s3 + $0xa4] ss:$16 sps:$4 sm:$0xff]  }
 0x118   : > { %v1503_v17 = vpop.f32.mrb[3].mxu0  ;;  %v1512_v22 = vadd.f32 %v2968_v16, %v3668_v12  ;;  %v2013_v26 = vmax.f32 %v1509_v18, 0.0  ;;  %v3680_v29 = vpop.f32.mrb[3].mxu1  ;;  %2541 = vmatprep.subr.bf16.mxu1 %v3226_v14 }
 0x119   : > { %v1504_v19 = vadd.f32 %v3668_v12, %v1503_v17  ;;  %v2011_v21 = vmax.f32 %v1501_v15, 0.0  ;;  %2542 = vmatpush1.bf16.msra.mxu1 %v3224_v13 }
 0x11a   : > { %v2014_v31 = vmax.f32 %v1512_v22, 0.0 }
 0x11b   : > { %v2012_v23 = vmax.f32 %v1504_v19, 0.0 }
 0x11d   : > { %v2140_v27 = vadd.f32 %v2012_v23, %v2011_v21  ;;  %v2971_v28 = vpop.f32.mrb[4].mxu0  ;;  %v3047_v40 = vpop.f32.mrb[4].mxu1 }
 0x11e   : > { %v1516_v30 = vpop.f32.mrb[5].mxu0  ;;  %v1525_v36 = vadd.f32 %v2971_v28, %v3668_v12  ;;  %v1820_v44 = vpop.f32.mrb[5].mxu1  ;;  %v1829_v45 = vadd.f32 %v3047_v40, %v3668_v12 }
 0x11f   : > { %v2141_v32 = vadd.f32 %v2140_v27, %v2013_v26  ;;  %v1517_v33 = vadd.f32 %v3668_v12, %v1516_v30  ;;  %v2972_v34 = vpop.f32.mrb[6].mxu0  ;;  %v1821_v46 = vadd.f32 %v3668_v12, %v1820_v44  ;;  %v3048_v47 = vpop.f32.mrb[6].mxu1 }
 0x120   : > { %v1519_v35 = vpop.f32.mrb[7].mxu0  ;;  %v1528_v42 = vadd.f32 %v2972_v34, %v3668_v12  ;;  %v2017_v48 = vmax.f32 %v1525_v36, 0.0  ;;  %v1823_v51 = vpop.f32.mrb[7].mxu1  ;;  %v1832_v54 = vadd.f32 %v3048_v47, %v3668_v12  ;;  %v2093_v63 = vmax.f32 %v1829_v45, 0.0 }
 0x121   : > { %v2015_v37 = vmax.f32 %v1517_v33, 0.0  ;;  %v2142_v38 = vadd.f32 %v2141_v32, %v2014_v31  ;;  %v1520_v39 = vadd.f32 %v3668_v12, %v1519_v35  ;;  %v2091_v53 = vmax.f32 %v1821_v46, 0.0 }
 0x122   : > { %v1824_v55 = vadd.f32 %v3668_v12, %v1823_v51  ;;  %v2018_v56 = vmax.f32 %v1528_v42, 0.0  ;;  %v2094_v5 = vmax.f32 %v1832_v54, 0.0 }
 0x123   : > { %v2143_v41 = vadd.f32 %v2142_v38, %v2015_v37  ;;  %v2016_v43 = vmax.f32 %v1520_v39, 0.0 }
 0x124   : > { %v2092_v0 = vmax.f32 %v1824_v55, 0.0 }
 0x125   : > { %v2144_v49 = vadd.f32 %v2143_v41, %v2016_v43  ;;  %v2975_v50 = vpop.f32.mrb[8].mxu0  ;;  %v3051_v7 = vpop.f32.mrb[8].mxu1 }
 0x126   : > { %v1532_v52 = vpop.f32.mrb[9].mxu0  ;;  %v1541_v1 = vadd.f32 %v2975_v50, %v3668_v12  ;;  %v2245_v6 = vadd.f32 %v2092_v0, %v2091_v53  ;;  %v1836_v11 = vpop.f32.mrb[9].mxu1  ;;  %v1845_v16 = vadd.f32 %v3051_v7, %v3668_v12 }
 0x127   : > { %v2145_v57 = vadd.f32 %v2144_v49, %v2017_v48  ;;  %v1533_v58 = vadd.f32 %v3668_v12, %v1532_v52  ;;  %v2976_v59 = vpop.f32.mrb[10].mxu0  ;;  %v1837_v17 = vadd.f32 %v3668_v12, %v1836_v11  ;;  %v3052_v18 = vpop.f32.mrb[10].mxu1 }
 0x128   : > { %v1535_v62 = vpop.f32.mrb[11].mxu0  ;;  %v1544_v9 = vadd.f32 %v2976_v59, %v3668_v12  ;;  %v2246_v15 = vadd.f32 %v2245_v6, %v2093_v63  ;;  %v2021_v19 = vmax.f32 %v1541_v1, 0.0  ;;  %v1839_v23 = vpop.f32.mrb[11].mxu1  ;;  %v1848_v30 = vadd.f32 %v3052_v18, %v3668_v12 }
 0x129   : > { %v2019_v2 = vmax.f32 %v1533_v58, 0.0  ;;  %v2146_v3 = vadd.f32 %v2145_v57, %v2018_v56  ;;  %v1536_v4 = vadd.f32 %v3668_v12, %v1535_v62  ;;  %v2095_v27 = vmax.f32 %v1837_v17, 0.0 }
 0x12a   : > { %v2247_v28 = vadd.f32 %v2246_v15, %v2094_v5  ;;  %v1840_v31 = vadd.f32 %v3668_v12, %v1839_v23  ;;  %v2022_v32 = vmax.f32 %v1544_v9, 0.0  ;;  %v2097_v37 = vmax.f32 %v1845_v16, 0.0 }
 0x12b   : > { %v2147_v8 = vadd.f32 %v2146_v3, %v2019_v2  ;;  %v2020_v10 = vmax.f32 %v1536_v4, 0.0  ;;  %v2098_v44 = vmax.f32 %v1848_v30, 0.0 }
 0x12c   : > { %v2248_v38 = vadd.f32 %v2247_v28, %v2095_v27  ;;  %v2096_v39 = vmax.f32 %v1840_v31, 0.0 }
 0x12d   : > { %v2148_v21 = vadd.f32 %v2147_v8, %v2020_v10  ;;  %v2979_v22 = vpop.f32.mrb[12].mxu0  ;;  %v3055_v46 = vpop.f32.mrb[12].mxu1 }
 0x12e   : > { %v1548_v26 = vpop.f32.mrb[13].mxu0  ;;  %v1557_v40 = vadd.f32 %v2979_v22, %v3668_v12  ;;  %v2249_v45 = vadd.f32 %v2248_v38, %v2096_v39  ;;  %v1852_v50 = vpop.f32.mrb[13].mxu1  ;;  %v1861_v52 = vadd.f32 %v3055_v46, %v3668_v12 }
 0x12f   : > { %v2149_v33 = vadd.f32 %v2148_v21, %v2021_v19  ;;  %v1549_v34 = vadd.f32 %v3668_v12, %v1548_v26  ;;  %v2980_v35 = vpop.f32.mrb[14].mxu0  ;;  %v1853_v53 = vadd.f32 %v3668_v12, %v1852_v50  ;;  %v3056_v54 = vpop.f32.mrb[14].mxu1 }
 0x130   : > { %v1551_v36 = vpop.f32.mrb[15].mxu0  ;;  %v1560_v48 = vadd.f32 %v2980_v35, %v3668_v12  ;;  %v2250_v51 = vadd.f32 %v2249_v45, %v2097_v37  ;;  %v2025_v55 = vmax.f32 %v1557_v40, 0.0  ;;  %v1855_v58 = vpop.f32.mrb[15].mxu1  ;;  %v1864_v62 = vadd.f32 %v3056_v54, %v3668_v12 }
 0x131   : > { %v2023_v41 = vmax.f32 %v1549_v34, 0.0  ;;  %v2150_v42 = vadd.f32 %v2149_v33, %v2022_v32  ;;  %v1552_v43 = vadd.f32 %v3668_v12, %v1551_v36  ;;  %v2099_v60 = vmax.f32 %v1853_v53, 0.0 }
 0x132   : > { %v2251_v61 = vadd.f32 %v2250_v51, %v2098_v44  ;;  %v1856_v63 = vadd.f32 %v3668_v12, %v1855_v58  ;;  %v2026_v0 = vmax.f32 %v1560_v48, 0.0  ;;  %v2101_v5 = vmax.f32 %v1861_v52, 0.0 }
 0x133   : > { %v2151_v47 = vadd.f32 %v2150_v42, %v2023_v41  ;;  %v2024_v49 = vmax.f32 %v1552_v43, 0.0  ;;  %v2102_v11 = vmax.f32 %v1864_v62, 0.0 }
 0x134   : > { %v2252_v6 = vadd.f32 %v2251_v61, %v2099_v60  ;;  %v2100_v7 = vmax.f32 %v1856_v63, 0.0 }
 0x135   : > { %v2152_v56 = vadd.f32 %v2151_v47, %v2024_v49  ;;  %v2983_v57 = vpop.f32.mrb[16].mxu0  ;;  %v3059_v14 = vpop.f32.mrb[16].mxu1 }
 0x136   : > { %v1564_v59 = vpop.f32.mrb[17].mxu0  ;;  %v1573_v9 = vadd.f32 %v2983_v57, %v3668_v12  ;;  %v2253_v13 = vadd.f32 %v2252_v6, %v2100_v7  ;;  %v1868_v18 = vpop.f32.mrb[17].mxu1  ;;  %v1877_v21 = vadd.f32 %v3059_v14, %v3668_v12  ;;  %v3232_v6 = vld [vmem:[%s3923_s3 + $0xe4] ss:$16 sps:$4 sm:$0xff]  }
 0x137   : > { %v2153_v1 = vadd.f32 %v2152_v56, %v2025_v55  ;;  %v1565_v2 = vadd.f32 %v3668_v12, %v1564_v59  ;;  %v2984_v3 = vpop.f32.mrb[18].mxu0  ;;  %v1869_v22 = vadd.f32 %v3668_v12, %v1868_v18  ;;  %v3060_v23 = vpop.f32.mrb[18].mxu1  ;;  %v3229_v59 = vld [vmem:[%s3923_s3 + $0xc4] ss:$16 sps:$4 sm:$0xff]   ;;  %v3235_v18 = vld [vmem:[%s3923_s3 + $0xc] ss:$16 sps:$4 sm:$0xff]  }
 0x138   : > { %v1567_v4 = vpop.f32.mrb[19].mxu0  ;;  %v1576_v16 = vadd.f32 %v2984_v3, %v3668_v12  ;;  %v2254_v19 = vadd.f32 %v2253_v13, %v2101_v5  ;;  %v2029_v26 = vmax.f32 %v1573_v9, 0.0  ;;  %v1871_v30 = vpop.f32.mrb[19].mxu1  ;;  %v1880_v34 = vadd.f32 %v3060_v23, %v3668_v12  ;;  %2543 = vmatprep.subr.bf16.mxu1 %v3229_v59  ;;  %v3230_v13 = vld [vmem:[%s3923_s3 + $0xe0] ss:$16 sps:$4 sm:$0xff]  }
 0x139   : > { %v3719_v8 = vadd.f32 %v2153_v1, %v2026_v0  ;;  %v1568_v10 = vadd.f32 %v3668_v12, %v1567_v4  ;;  %v2027_v15 = vmax.f32 %v1565_v2, 0.0  ;;  %v2103_v32 = vmax.f32 %v1869_v22, 0.0  ;;  %v3227_v0 = vld [vmem:[%s3923_s3 + $0xc0] ss:$16 sps:$4 sm:$0xff]  }
 0x13a   : > { %v2255_v33 = vadd.f32 %v2254_v19, %v2102_v11  ;;  %v1872_v35 = vadd.f32 %v3668_v12, %v1871_v30  ;;  %v2030_v36 = vmax.f32 %v1576_v16, 0.0  ;;  %v2105_v41 = vmax.f32 %v1877_v21, 0.0  ;;  %2544 = vmatpush1.bf16.msra.mxu1 %v3227_v0 }
 0x13b   : > { %v2028_v17 = vmax.f32 %v1568_v10, 0.0  ;;  %v2106_v48 = vmax.f32 %v1880_v34, 0.0  ;;  %2545 = vmatprep.subr.bf16.mxu1 %v3232_v6 }
 0x13c   : > { %v2256_v42 = vadd.f32 %v2255_v33, %v2103_v32  ;;  %v2104_v43 = vmax.f32 %v1872_v35, 0.0 }
 0x13d   : > { %v2161_v27 = vadd.f32 %v2028_v17, %v2027_v15  ;;  %v2987_v28 = vpop.f32.mrb[20].mxu0  ;;  %v3063_v50 = vpop.f32.mrb[20].mxu1  ;;  %v3298_v17 = vmov 0  }
 0x13e   : > { %v1580_v31 = vpop.f32.mrb[21].mxu0  ;;  %v1589_v44 = vadd.f32 %v2987_v28, %v3668_v12  ;;  %v2257_v49 = vadd.f32 %v2256_v42, %v2104_v43  ;;  %v1884_v54 = vpop.f32.mrb[21].mxu1  ;;  %v1893_v56 = vadd.f32 %v3063_v50, %v3668_v12  ;;  %2563 = vmatprep.mubr.bf16.mxu1 %v3298_v17  ;;  %2546 = vmatpush1.bf16.msra.mxu1 %v3230_v13 }
 0x13f   : > { %v2162_v37 = vadd.f32 %v2161_v27, %v2029_v26  ;;  %v1581_v38 = vadd.f32 %v3668_v12, %v1580_v31  ;;  %v2988_v39 = vpop.f32.mrb[22].mxu0  ;;  %v1885_v57 = vadd.f32 %v3668_v12, %v1884_v54  ;;  %v3064_v58 = vpop.f32.mrb[22].mxu1  ;;  %2572 = vmatprep.subr.bf16.mxu1 %v3235_v18 }
 0x140   : > { %v1583_v40 = vpop.f32.mrb[23].mxu0  ;;  %v1592_v52 = vadd.f32 %v2988_v39, %v3668_v12  ;;  %v2258_v55 = vadd.f32 %v2257_v49, %v2105_v41  ;;  %v2033_v60 = vmax.f32 %v1589_v44, 0.0  ;;  %v1887_v63 = vpop.f32.mrb[23].mxu1  ;;  %v1896_v4 = vadd.f32 %v3064_v58, %v3668_v12 }
 0x141   : > { %v2031_v45 = vmax.f32 %v1581_v38, 0.0  ;;  %v2163_v46 = vadd.f32 %v2162_v37, %v2030_v36  ;;  %v1584_v47 = vadd.f32 %v3668_v12, %v1583_v40  ;;  %v2107_v3 = vmax.f32 %v1885_v57, 0.0 }
 0x142   : > { %v3740_v2 = vadd.f32 %v2258_v55, %v2106_v48  ;;  %v1888_v5 = vadd.f32 %v3668_v12, %v1887_v63  ;;  %v2034_v7 = vmax.f32 %v1592_v52, 0.0  ;;  %v2109_v15 = vmax.f32 %v1893_v56, 0.0 }
 0x143   : > { %v2164_v51 = vadd.f32 %v2163_v46, %v2031_v45  ;;  %v2032_v53 = vmax.f32 %v1584_v47, 0.0  ;;  %v2110_v26 = vmax.f32 %v1896_v4, 0.0 }
 0x144   : > { %v2108_v16 = vmax.f32 %v1888_v5, 0.0 }
 0x145   : > { %v2165_v61 = vadd.f32 %v2164_v51, %v2032_v53  ;;  %v2991_v62 = vpop.f32.mrb[24].mxu0  ;;  %v3067_v28 = vpop.f32.mrb[24].mxu1  ;;  %v2155_v51 = vrot.slane %v3719_v8, 4 }
 0x146   : > { %v1596_v1 = vpop.f32.mrb[25].mxu0  ;;  %v1605_v19 = vadd.f32 %v2991_v62, %v3668_v12  ;;  %v2266_v27 = vadd.f32 %v2108_v16, %v2107_v3  ;;  %v1900_v33 = vpop.f32.mrb[25].mxu1  ;;  %v1909_v35 = vadd.f32 %v3067_v28, %v3668_v12 }
 0x147   : > { %v2166_v9 = vadd.f32 %v2165_v61, %v2033_v60  ;;  %v1597_v10 = vadd.f32 %v3668_v12, %v1596_v1  ;;  %v2992_v11 = vpop.f32.mrb[26].mxu0  ;;  %v1901_v36 = vadd.f32 %v3668_v12, %v1900_v33  ;;  %v3068_v37 = vpop.f32.mrb[26].mxu1  ;;  %v2156_v4 = vadd.f32 %v2155_v51, %v3719_v8 }
 0x148   : > { %v1599_v14 = vpop.f32.mrb[27].mxu0  ;;  %v1608_v31 = vadd.f32 %v2992_v11, %v3668_v12  ;;  %v2267_v34 = vadd.f32 %v2266_v27, %v2109_v15  ;;  %v2037_v38 = vmax.f32 %v1605_v19, 0.0  ;;  %v1903_v41 = vpop.f32.mrb[27].mxu1  ;;  %v1912_v45 = vadd.f32 %v3068_v37, %v3668_v12 }
 0x149   : > { %v2035_v21 = vmax.f32 %v1597_v10, 0.0  ;;  %v2167_v22 = vadd.f32 %v2166_v9, %v2034_v7  ;;  %v1600_v23 = vadd.f32 %v3668_v12, %v1599_v14  ;;  %v2111_v43 = vmax.f32 %v1901_v36, 0.0 }
 0x14a   : > { %v2268_v44 = vadd.f32 %v2267_v34, %v2110_v26  ;;  %v2038_v46 = vmax.f32 %v1608_v31, 0.0  ;;  %v1904_v50 = vadd.f32 %v3668_v12, %v1903_v41  ;;  %v2113_v54 = vmax.f32 %v1909_v35, 0.0 }
 0x14b   : > { %v2168_v30 = vadd.f32 %v2167_v22, %v2035_v21  ;;  %v2036_v32 = vmax.f32 %v1600_v23, 0.0  ;;  %v2114_v60 = vmax.f32 %v1912_v45, 0.0  ;;  %v2157_v27 = vrot.slane %v2156_v4, 2 }
 0x14c   : > { %v2269_v55 = vadd.f32 %v2268_v44, %v2111_v43  ;;  %v2112_v59 = vmax.f32 %v1904_v50, 0.0 }
 0x14d   : > { %v2169_v39 = vadd.f32 %v2168_v30, %v2036_v32  ;;  %v2995_v40 = vpop.f32.mrb[28].mxu0  ;;  %v3071_v61 = vpop.f32.mrb[28].mxu1  ;;  %v2158_v44 = vadd.f32 %v2157_v27, %v2156_v4 }
 0x14e   : > { %v1612_v42 = vpop.f32.mrb[29].mxu0  ;;  %v1621_v52 = vadd.f32 %v2995_v40, %v3668_v12  ;;  %v2270_v1 = vadd.f32 %v2269_v55, %v2112_v59  ;;  %v1916_v3 = vpop.f32.mrb[29].mxu1  ;;  %v1925_v5 = vadd.f32 %v3071_v61, %v3668_v12 }
 0x14f   : > { %v2170_v47 = vadd.f32 %v2169_v39, %v2037_v38  ;;  %v1613_v48 = vadd.f32 %v3668_v12, %v1612_v42  ;;  %v2996_v49 = vpop.f32.mrb[30].mxu0  ;;  %v1917_v6 = vadd.f32 %v3668_v12, %v1916_v3  ;;  %v3072_v7 = vpop.f32.mrb[30].mxu1 }
 0x150   : > { %v1615_v53 = vpop.f32.mrb[31].mxu0  ;;  %v1624_v63 = vadd.f32 %v2996_v49, %v3668_v12  ;;  %v2041_v9 = vmax.f32 %v1621_v52, 0.0  ;;  %v2271_v13 = vadd.f32 %v2270_v1, %v2113_v54  ;;  %v1919_v14 = vpop.f32.mrb[31].mxu1  ;;  %v1928_v18 = vadd.f32 %v3072_v7, %v3668_v12 }
 0x151   : > { %v2039_v56 = vmax.f32 %v1613_v48, 0.0  ;;  %v2171_v57 = vadd.f32 %v2170_v47, %v2038_v46  ;;  %v1616_v58 = vadd.f32 %v3668_v12, %v1615_v53  ;;  %v2115_v16 = vmax.f32 %v1917_v6, 0.0 }
 0x152   : > { %v1920_v19 = vadd.f32 %v3668_v12, %v1919_v14  ;;  %v2042_v21 = vmax.f32 %v1624_v63, 0.0  ;;  %v2272_v26 = vadd.f32 %v2271_v13, %v2114_v60  ;;  %v2117_v30 = vmax.f32 %v1925_v5, 0.0 }
 0x153   : > { %v2172_v62 = vadd.f32 %v2171_v57, %v2039_v56  ;;  %v2040_v0 = vmax.f32 %v1616_v58, 0.0  ;;  %v2118_v37 = vmax.f32 %v1928_v18, 0.0  ;;  %v2159_v63 = vrot.slane %v2158_v44, 1 }
 0x154   : > { %v2116_v31 = vmax.f32 %v1920_v19, 0.0  ;;  %v2273_v35 = vadd.f32 %v2272_v26, %v2115_v16 }
 0x155   : > { %v2173_v10 = vadd.f32 %v2172_v62, %v2040_v0  ;;  %v2999_v11 = vpop.f32.mrb[32].mxu0  ;;  %v3075_v38 = vpop.f32.mrb[32].mxu1  ;;  %v2160_v27 = vadd.f32 %v2159_v63, %v2158_v44 }
 0x156   : > { %v1628_v15 = vpop.f32.mrb[33].mxu0  ;;  %v1637_v33 = vadd.f32 %v2999_v11, %v3668_v12  ;;  %v2274_v42 = vadd.f32 %v2273_v35, %v2116_v31  ;;  %v1932_v43 = vpop.f32.mrb[33].mxu1  ;;  %v1941_v55 = vadd.f32 %v3075_v38, %v3668_v12 }
 0x157   : > { %v2174_v22 = vadd.f32 %v2173_v10, %v2041_v9  ;;  %v1629_v8 = vadd.f32 %v3668_v12, %v1628_v15  ;;  %v3000_v23 = vpop.f32.mrb[34].mxu0  ;;  %v1933_v45 = vadd.f32 %v3668_v12, %v1932_v43  ;;  %v3076_v46 = vpop.f32.mrb[34].mxu1 }
 0x158   : > { %v1631_v28 = vpop.f32.mrb[35].mxu0  ;;  %v1640_v36 = vadd.f32 %v3000_v23, %v3668_v12  ;;  %v2045_v48 = vmax.f32 %v1637_v33, 0.0  ;;  %v2275_v51 = vadd.f32 %v2274_v42, %v2117_v30  ;;  %v1935_v52 = vpop.f32.mrb[35].mxu1  ;;  %v1944_v3 = vadd.f32 %v3076_v46, %v3668_v12 }
 0x159   : > { %v2175_v32 = vadd.f32 %v2174_v22, %v2042_v21  ;;  %v1632_v34 = vadd.f32 %v3668_v12, %v1631_v28  ;;  %v2043_v40 = vmax.f32 %v1629_v8, 0.0  ;;  %v2119_v56 = vmax.f32 %v1933_v45, 0.0 }
 0x15a   : > { %v2046_v53 = vmax.f32 %v1640_v36, 0.0  ;;  %v1936_v57 = vadd.f32 %v3668_v12, %v1935_v52  ;;  %v2276_v62 = vadd.f32 %v2275_v51, %v2118_v37  ;;  %v2121_v10 = vmax.f32 %v1941_v55, 0.0 }
 0x15b   : > { %v2176_v39 = vrot.slane %v2175_v32, 4  ;;  %v2044_v41 = vmax.f32 %v1632_v34, 0.0  ;;  %v2122_v21 = vmax.f32 %v1944_v3, 0.0 }
 0x15c   : > { %v2120_v4 = vmax.f32 %v1936_v57, 0.0  ;;  %v2277_v11 = vadd.f32 %v2276_v62, %v2119_v56 }
 0x15d   : > { %v2177_v47 = vadd.f32 %v2176_v39, %v2175_v32  ;;  %v2182_v49 = vadd.f32 %v2044_v41, %v2043_v40  ;;  %v3003_v50 = vpop.f32.mrb[36].mxu0  ;;  %v3079_v13 = vpop.f32.mrb[36].mxu1 }
 0x15e   : > { %v1644_v54 = vpop.f32.mrb[37].mxu0  ;;  %v1653_v0 = vadd.f32 %v3003_v50, %v3668_v12  ;;  %v1948_v19 = vpop.f32.mrb[37].mxu1  ;;  %v2278_v22 = vadd.f32 %v2277_v11, %v2120_v4  ;;  %v1957_v8 = vadd.f32 %v3079_v13, %v3668_v12 }
 0x15f   : > { %v2178_v58 = vrot.slane %v2177_v47, 2  ;;  %v2183_v59 = vadd.f32 %v2182_v49, %v2045_v48  ;;  %v1645_v60 = vadd.f32 %v3668_v12, %v1644_v54  ;;  %v3004_v61 = vpop.f32.mrb[38].mxu0  ;;  %v1949_v23 = vadd.f32 %v3668_v12, %v1948_v19  ;;  %v3080_v26 = vpop.f32.mrb[38].mxu1 }
 0x160   : > { %v1647_v1 = vpop.f32.mrb[39].mxu0  ;;  %v1656_v16 = vadd.f32 %v3004_v61, %v3668_v12  ;;  %v2049_v30 = vmax.f32 %v1653_v0, 0.0  ;;  %v1951_v33 = vpop.f32.mrb[39].mxu1  ;;  %v2279_v35 = vadd.f32 %v2278_v22, %v2121_v10  ;;  %v1960_v37 = vadd.f32 %v3080_v26, %v3668_v12 }
 0x161   : > { %v2179_v5 = vadd.f32 %v2178_v58, %v2177_v47  ;;  %v2047_v6 = vmax.f32 %v1645_v60, 0.0  ;;  %v2184_v7 = vadd.f32 %v2183_v59, %v2046_v53  ;;  %v1648_v9 = vadd.f32 %v3668_v12, %v1647_v1 }
 0x162   : > { %v2123_v36 = vmax.f32 %v1949_v23, 0.0  ;;  %v1952_v38 = vadd.f32 %v3668_v12, %v1951_v33  ;;  %v2050_v40 = vmax.f32 %v1656_v16, 0.0  ;;  %v3792_v45 = vadd.f32 %v2279_v35, %v2122_v21 }
 0x163   : > { %v2180_v14 = vrot.slane %v2179_v5, 1  ;;  %v2185_v15 = vadd.f32 %v2184_v7, %v2047_v6  ;;  %v2048_v18 = vmax.f32 %v1648_v9, 0.0  ;;  %v2125_v46 = vmax.f32 %v1957_v8, 0.0 }
 0x164   : > { %v2124_v47 = vmax.f32 %v1952_v38, 0.0  ;;  %v2126_v52 = vmax.f32 %v1960_v37, 0.0 }
 0x165   : > { %v2181_v28 = vadd.f32 %v2180_v14, %v2179_v5  ;;  %v2186_v31 = vadd.f32 %v2185_v15, %v2048_v18  ;;  %v3007_v32 = vpop.f32.mrb[40].mxu0  ;;  %v3083_v54 = vpop.f32.mrb[40].mxu1 }
 0x166   : > { %v1660_v34 = vpop.f32.mrb[41].mxu0  ;;  %v1669_v48 = vadd.f32 %v3007_v32, %v3668_v12  ;;  %v2287_v53 = vadd.f32 %v2124_v47, %v2123_v36  ;;  %v1964_v58 = vpop.f32.mrb[41].mxu1  ;;  %v1973_v60 = vadd.f32 %v3083_v54, %v3668_v12 }
 0x167   : > { %v3789_v39 = vsel %vm2316_vm2, %v2181_v28, %v2160_v27  ;;  %v2187_v41 = vadd.f32 %v2186_v31, %v2049_v30  ;;  %v1661_v42 = vadd.f32 %v3668_v12, %v1660_v34  ;;  %v3008_v43 = vpop.f32.mrb[42].mxu0  ;;  %v1965_v61 = vadd.f32 %v3668_v12, %v1964_v58  ;;  %v3084_v62 = vpop.f32.mrb[42].mxu1 }
 0x168   : > { %v1663_v44 = vpop.f32.mrb[43].mxu0  ;;  %v1672_v56 = vadd.f32 %v3008_v43, %v3668_v12  ;;  %v2288_v59 = vadd.f32 %v2287_v53, %v2125_v46  ;;  %v2053_v63 = vmax.f32 %v1669_v48, 0.0  ;;  %v1967_v3 = vpop.f32.mrb[43].mxu1  ;;  %v1976_v7 = vadd.f32 %v3084_v62, %v3668_v12 }
 0x169   : > { %v2051_v49 = vmax.f32 %v1661_v42, 0.0  ;;  %v2188_v50 = vadd.f32 %v2187_v41, %v2050_v40  ;;  %v1664_v51 = vadd.f32 %v3668_v12, %v1663_v44  ;;  %v2127_v5 = vmax.f32 %v1965_v61, 0.0 }
 0x16a   : > { %v2289_v6 = vadd.f32 %v2288_v59, %v2126_v52  ;;  %v2054_v9 = vmax.f32 %v1672_v56, 0.0  ;;  %v1968_v14 = vadd.f32 %v3668_v12, %v1967_v3  ;;  %v2129_v18 = vmax.f32 %v1973_v60, 0.0 }
 0x16b   : > { %v2189_v55 = vadd.f32 %v2188_v50, %v2051_v49  ;;  %v2052_v57 = vmax.f32 %v1664_v51, 0.0  ;;  %v2130_v26 = vmax.f32 %v1976_v7, 0.0 }
 0x16c   : > { %v2290_v19 = vadd.f32 %v2289_v6, %v2127_v5  ;;  %v2128_v23 = vmax.f32 %v1968_v14, 0.0 }
 0x16d   : > { %v2190_v0 = vadd.f32 %v2189_v55, %v2052_v57  ;;  %v3011_v1 = vpop.f32.mrb[44].mxu0  ;;  %v3087_v27 = vpop.f32.mrb[44].mxu1 }
 0x16e   : > { %v1676_v4 = vpop.f32.mrb[45].mxu0  ;;  %v1685_v15 = vadd.f32 %v3011_v1, %v3668_v12  ;;  %v2291_v32 = vadd.f32 %v2290_v19, %v2128_v23  ;;  %v1980_v33 = vpop.f32.mrb[45].mxu1  ;;  %v1989_v34 = vadd.f32 %v3087_v27, %v3668_v12 }
 0x16f   : > { %v2191_v10 = vadd.f32 %v2190_v0, %v2053_v63  ;;  %v1677_v11 = vadd.f32 %v3668_v12, %v1676_v4  ;;  %v3012_v13 = vpop.f32.mrb[46].mxu0  ;;  %v1981_v35 = vadd.f32 %v3668_v12, %v1980_v33  ;;  %v3088_v36 = vpop.f32.mrb[46].mxu1 }
 0x170   : > { %v1679_v16 = vpop.f32.mrb[47].mxu0  ;;  %v1688_v30 = vadd.f32 %v3012_v13, %v3668_v12  ;;  %v2057_v37 = vmax.f32 %v1685_v15, 0.0  ;;  %v2292_v41 = vadd.f32 %v2291_v32, %v2129_v18  ;;  %v1983_v42 = vpop.f32.mrb[47].mxu1  ;;  %v1992_v46 = vadd.f32 %v3088_v36, %v3668_v12 }
 0x171   : > { %v2055_v21 = vmax.f32 %v1677_v11, 0.0  ;;  %v2192_v22 = vadd.f32 %v2191_v10, %v2054_v9  ;;  %v1680_v8 = vadd.f32 %v3668_v12, %v1679_v16  ;;  %v2131_v44 = vmax.f32 %v1981_v35, 0.0 }
 0x172   : > { %v1984_v47 = vadd.f32 %v3668_v12, %v1983_v42  ;;  %v2058_v48 = vmax.f32 %v1688_v30, 0.0  ;;  %v2293_v52 = vadd.f32 %v2292_v41, %v2130_v26  ;;  %v2133_v54 = vmax.f32 %v1989_v34, 0.0 }
 0x173   : > { %v2193_v28 = vadd.f32 %v2192_v22, %v2055_v21  ;;  %v2056_v31 = vmax.f32 %v1680_v8, 0.0  ;;  %v2134_v61 = vmax.f32 %v1992_v46, 0.0 }
 0x174   : > { %v2132_v55 = vmax.f32 %v1984_v47, 0.0  ;;  %v2294_v59 = vadd.f32 %v2293_v52, %v2131_v44 }
 0x175   : > { %v2194_v38 = vadd.f32 %v2193_v28, %v2056_v31  ;;  %v3015_v40 = vpop.f32.mrb[48].mxu0  ;;  %v3091_v62 = vpop.f32.mrb[48].mxu1 }
 0x176   : > { %v1692_v43 = vpop.f32.mrb[49].mxu0  ;;  %v1701_v57 = vadd.f32 %v3015_v40, %v3668_v12  ;;  %v2295_v3 = vadd.f32 %v2294_v59, %v2132_v55  ;;  %v1996_v4 = vpop.f32.mrb[49].mxu1  ;;  %v2005_v18 = vadd.f32 %v3091_v62, %v3668_v12 }
 0x177   : > { %v2195_v49 = vadd.f32 %v2194_v38, %v2057_v37  ;;  %v1693_v50 = vadd.f32 %v3668_v12, %v1692_v43  ;;  %v3016_v51 = vpop.f32.mrb[50].mxu0  ;;  %v1997_v5 = vadd.f32 %v3668_v12, %v1996_v4  ;;  %v3092_v6 = vpop.f32.mrb[50].mxu1 }
 0x178   : > { %v1695_v53 = vpop.f32.mrb[51].mxu0  ;;  %v1704_v60 = vadd.f32 %v3016_v51, %v3668_v12  ;;  %v2061_v9 = vmax.f32 %v1701_v57, 0.0  ;;  %v2296_v13 = vadd.f32 %v2295_v3, %v2133_v54  ;;  %v1999_v14 = vpop.f32.mrb[51].mxu1  ;;  %v2008_v31 = vadd.f32 %v3092_v6, %v3668_v12 }
 0x179   : > { %v2196_v56 = vadd.f32 %v2195_v49, %v2058_v48  ;;  %v1696_v58 = vadd.f32 %v3668_v12, %v1695_v53  ;;  %v2059_v0 = vmax.f32 %v1693_v50, 0.0  ;;  %v2135_v19 = vmax.f32 %v1997_v5, 0.0 }
 0x17a   : > { %v2062_v15 = vmax.f32 %v1704_v60, 0.0  ;;  %v2000_v21 = vadd.f32 %v3668_v12, %v1999_v14  ;;  %v2297_v27 = vadd.f32 %v2296_v13, %v2134_v61  ;;  %v2137_v37 = vmax.f32 %v2005_v18, 0.0 }
 0x17b   : > { %v2197_v63 = vrot.slane %v2196_v56, 4  ;;  %v2060_v1 = vmax.f32 %v1696_v58, 0.0  ;;  %v2138_v44 = vmax.f32 %v2008_v31, 0.0 }
 0x17c   : > { %v2136_v32 = vmax.f32 %v2000_v21, 0.0  ;;  %v2298_v38 = vadd.f32 %v2297_v27, %v2135_v19 }
 0x17d   : > { %v2198_v7 = vadd.f32 %v2197_v63, %v2196_v56  ;;  %v2203_v10 = vadd.f32 %v2060_v1, %v2059_v0  ;;  %v3019_v11 = vpop.f32.mrb[52].mxu0 }
 0x17e   : > { %v1708_v16 = vpop.f32.mrb[53].mxu0  ;;  %v1717_v28 = vadd.f32 %v3019_v11, %v3668_v12  ;;  %v2299_v46 = vadd.f32 %v2298_v38, %v2136_v32 }
 0x17f   : > { %v2199_v22 = vrot.slane %v2198_v7, 2  ;;  %v2204_v8 = vadd.f32 %v2203_v10, %v2061_v9  ;;  %v1709_v23 = vadd.f32 %v3668_v12, %v1708_v16  ;;  %v3020_v26 = vpop.f32.mrb[54].mxu0 }
 0x180   : > { %v1711_v30 = vpop.f32.mrb[55].mxu0  ;;  %v1720_v42 = vadd.f32 %v3020_v26, %v3668_v12  ;;  %v2065_v48 = vmax.f32 %v1717_v28, 0.0  ;;  %v2300_v52 = vadd.f32 %v2299_v46, %v2137_v37 }
 0x181   : > { %v2200_v33 = vadd.f32 %v2199_v22, %v2198_v7  ;;  %v2063_v34 = vmax.f32 %v1709_v23, 0.0  ;;  %v2205_v35 = vadd.f32 %v2204_v8, %v2062_v15  ;;  %v1712_v36 = vadd.f32 %v3668_v12, %v1711_v30 }
 0x182   : > { %v2066_v54 = vmax.f32 %v1720_v42, 0.0  ;;  %v3825_v59 = vadd.f32 %v2300_v52, %v2138_v44 }
 0x183   : > { %v2201_v40 = vrot.slane %v2200_v33, 1  ;;  %v2206_v41 = vadd.f32 %v2205_v35, %v2063_v34  ;;  %v2064_v43 = vmax.f32 %v1712_v36, 0.0 }
 0x185   : > { %v2202_v47 = vadd.f32 %v2201_v40, %v2200_v33  ;;  %v2207_v49 = vadd.f32 %v2206_v41, %v2064_v43  ;;  %v3023_v50 = vpop.f32.mrb[56].mxu0 }
 0x186   : > { %v1724_v51 = vpop.f32.mrb[57].mxu0  ;;  %v1733_v60 = vadd.f32 %v3023_v50, %v3668_v12 }
 0x187   : > { %v3822_v53 = vsel %vm2318_vm3, %v2202_v47, %v3789_v39  ;;  %v2208_v55 = vadd.f32 %v2207_v49, %v2065_v48  ;;  %v1725_v56 = vadd.f32 %v3668_v12, %v1724_v51  ;;  %v3024_v57 = vpop.f32.mrb[58].mxu0 }
 0x188   : > { %v1727_v58 = vpop.f32.mrb[59].mxu0  ;;  %v1736_v1 = vadd.f32 %v3024_v57, %v3668_v12  ;;  %v2069_v39 = vmax.f32 %v1733_v60, 0.0  ;;  %v3257_v60 = vld [vmem:[%s3922_s2] ss:$0 sm:$0xff] }
 0x189   : > { %v2067_v61 = vmax.f32 %v1725_v56, 0.0  ;;  %v2209_v62 = vadd.f32 %v2208_v55, %v2066_v54  ;;  %v1728_v63 = vadd.f32 %v3668_v12, %v1727_v58 }
 0x18a   : > { %v2070_v7 = vmax.f32 %v1736_v1, 0.0 }
 0x18b   : > { %v2210_v0 = vadd.f32 %v2209_v62, %v2067_v61  ;;  %v2068_v3 = vmax.f32 %v1728_v63, 0.0 }
 0x18d   : > { %v2211_v4 = vadd.f32 %v2210_v0, %v2068_v3  ;;  %v3027_v5 = vpop.f32.mrb[60].mxu0 }
 0x18e   : > { %v1740_v6 = vpop.f32.mrb[61].mxu0  ;;  %v1749_v14 = vadd.f32 %v3027_v5, %v3668_v12 }
 0x18f   : > { %v2212_v9 = vadd.f32 %v2211_v4, %v2069_v39  ;;  %v1741_v10 = vadd.f32 %v3668_v12, %v1740_v6  ;;  %v3028_v11 = vpop.f32.mrb[62].mxu0 }
 0x190   : > { %v1743_v13 = vpop.f32.mrb[63].mxu0  ;;  %v1752_v21 = vadd.f32 %v3028_v11, %v3668_v12  ;;  %v2073_v8 = vmax.f32 %v1749_v14, 0.0 }
 0x191   : > { %v2071_v15 = vmax.f32 %v1741_v10, 0.0  ;;  %v2213_v16 = vadd.f32 %v2212_v9, %v2070_v7  ;;  %v1744_v18 = vadd.f32 %v3668_v12, %v1743_v13 }
 0x192   : > { %v2074_v28 = vmax.f32 %v1752_v21, 0.0 }
 0x193   : > { %v2214_v19 = vadd.f32 %v2213_v16, %v2071_v15  ;;  %v2072_v22 = vmax.f32 %v1744_v18, 0.0 }
 0x195   : > { %v2215_v23 = vadd.f32 %v2214_v19, %v2072_v22  ;;  %v3031_v26 = vpop.f32.mrb[64].mxu0 }
 0x196   : > { %v1756_v27 = vpop.f32.mrb[65].mxu0  ;;  %v1765_v35 = vadd.f32 %v3031_v26, %v3668_v12 }
 0x197   : > { %v2216_v30 = vadd.f32 %v2215_v23, %v2073_v8  ;;  %v1757_v31 = vadd.f32 %v3668_v12, %v1756_v27  ;;  %v3032_v32 = vpop.f32.mrb[66].mxu0  ;;  %v1805_v8 = vadd.f32 %v3257_v60, %v3676_v24  ;;  %v1808_v27 = vadd.f32 %v3257_v60, %v3680_v29 }
 0x198   : > { %v1759_v33 = vpop.f32.mrb[67].mxu0  ;;  %v1768_v40 = vadd.f32 %v3032_v32, %v3668_v12  ;;  %v2077_v43 = vmax.f32 %v1765_v35, 0.0  ;;  %v2302_v24 = vrot.slane %v3825_v59, 4 }
 0x199   : > { %v2217_v34 = vadd.f32 %v2216_v30, %v2074_v28  ;;  %v1760_v36 = vadd.f32 %v3668_v12, %v1759_v33  ;;  %v2075_v38 = vmax.f32 %v1757_v31, 0.0  ;;  %v1813_v30 = vadd.f32 %v3257_v60, %v3673_v20 }
 0x19a   : > { %v2078_v49 = vmax.f32 %v1768_v40, 0.0  ;;  %v2087_v31 = vmax.f32 %v1805_v8, 0.0  ;;  %v2260_v33 = vrot.slane %v3740_v2, 4  ;;  %v2088_v35 = vmax.f32 %v1808_v27, 0.0 }
 0x19b   : > { %v2218_v37 = vrot.slane %v2217_v34, 4  ;;  %v2076_v41 = vmax.f32 %v1760_v36, 0.0  ;;  %v2281_v36 = vrot.slane %v3792_v45, 4 }
 0x19c   : > { %v2261_v29 = vadd.f32 %v2260_v33, %v3740_v2 }
 0x19d   : > { %v2219_v42 = vadd.f32 %v2218_v37, %v2217_v34  ;;  %v2224_v44 = vadd.f32 %v2076_v41, %v2075_v38  ;;  %v3035_v46 = vpop.f32.mrb[68].mxu0  ;;  %v1816_v34 = vadd.f32 %v3257_v60, %v3678_v25  ;;  %v2089_v38 = vmax.f32 %v1813_v30, 0.0 }
 0x19e   : > { %v1772_v47 = vpop.f32.mrb[69].mxu0  ;;  %v1781_v54 = vadd.f32 %v3035_v46, %v3668_v12  ;;  %v2262_v46 = vrot.slane %v2261_v29, 2 }
 0x19f   : > { %v2220_v48 = vrot.slane %v2219_v42, 2  ;;  %v2225_v50 = vadd.f32 %v2224_v44, %v2077_v43  ;;  %v1773_v51 = vadd.f32 %v3668_v12, %v1772_v47  ;;  %v3036_v52 = vpop.f32.mrb[70].mxu0  ;;  %v2090_v41 = vmax.f32 %v1816_v34, 0.0 }
 0x1a0   : > { %v1775_v55 = vpop.f32.mrb[71].mxu0  ;;  %v1784_v0 = vadd.f32 %v3257_v60, %v3036_v52  ;;  %v2081_v39 = vmax.f32 %v1781_v54, 0.0  ;;  %v2303_v43 = vadd.f32 %v2302_v24, %v3825_v59 }
 0x1a1   : > { %v2221_v56 = vadd.f32 %v2220_v48, %v2219_v42  ;;  %v2079_v57 = vmax.f32 %v1773_v51, 0.0  ;;  %v2226_v58 = vadd.f32 %v2225_v50, %v2078_v49  ;;  %v1776_v61 = vadd.f32 %v3257_v60, %v1775_v55 }
 0x1a2   : > { %v2082_v7 = vmax.f32 %v1784_v0, 0.0  ;;  %v2282_v42 = vadd.f32 %v2281_v36, %v3792_v45  ;;  %v2304_v48 = vrot.slane %v2303_v43, 2  ;;  %v2263_v50 = vadd.f32 %v2262_v46, %v2261_v29 }
 0x1a3   : > { %v2222_v62 = vrot.slane %v2221_v56, 1  ;;  %v2227_v63 = vadd.f32 %v2226_v58, %v2079_v57  ;;  %v2080_v1 = vmax.f32 %v1776_v61, 0.0 }
 0x1a4   : > { %v2283_v47 = vrot.slane %v2282_v42, 2  ;;  %v2305_v54 = vadd.f32 %v2304_v48, %v2303_v43 }
 0x1a5   : > { %v2223_v3 = vadd.f32 %v2222_v62, %v2221_v56  ;;  %v2228_v4 = vadd.f32 %v2227_v63, %v2080_v1  ;;  %v3039_v5 = vpop.f32.mrb[72].mxu0  ;;  %v2264_v56 = vrot.slane %v2263_v50, 1 }
 0x1a6   : > { %v1788_v6 = vpop.f32.mrb[73].mxu0  ;;  %v1797_v14 = vadd.f32 %v3257_v60, %v3039_v5  ;;  %v2284_v51 = vadd.f32 %v2283_v47, %v2282_v42  ;;  %v2306_v58 = vrot.slane %v2305_v54, 1  ;;  %v3238_v5 = vld [vmem:[%s3923_s3 + $0x2c] ss:$16 sps:$4 sm:$0xff]  }
 0x1a7   : > { %v2321_v12 = vsel %vm2320_vm4, %v2223_v3, %v3822_v53  ;;  %v2229_v9 = vadd.f32 %v2228_v4, %v2081_v39  ;;  %v1789_v10 = vadd.f32 %v3257_v60, %v1788_v6  ;;  %v3040_v11 = vpop.f32.mrb[74].mxu0  ;;  %v3233_v39 = vld [vmem:[%s3923_s3 + $0x8] ss:$16 sps:$4 sm:$0xff]  }
 0x1a8   : > { %v1791_v13 = vpop.f32.mrb[75].mxu0  ;;  %v1800_v21 = vadd.f32 %v3257_v60, %v3040_v11  ;;  %v2085_v23 = vmax.f32 %v1797_v14, 0.0  ;;  %v2285_v57 = vrot.slane %v2284_v51, 1  ;;  %v2307_v62 = vadd.f32 %v2306_v58, %v2305_v54  ;;  %v3236_v6 = vld [vmem:[%s3923_s3 + $0x28] ss:$16 sps:$4 sm:$0xff]  }
 0x1a9   : > { %v2083_v15 = vmax.f32 %v1789_v10, 0.0  ;;  %v2230_v16 = vadd.f32 %v2229_v9, %v2082_v7  ;;  %v1792_v18 = vadd.f32 %v3257_v60, %v1791_v13  ;;  %v2265_v60 = vadd.f32 %v2264_v56, %v2263_v50  ;;  %v3239_v7 = vld [vmem:[%s3923_s3 + $0x48] ss:$16 sps:$4 sm:$0xff]   ;;  %v3244_v9 = vld [vmem:[%s3923_s3 + $0x6c] ss:$16 sps:$4 sm:$0xff]  }
 0x1aa   : > { %v2086_v28 = vmax.f32 %v1800_v21, 0.0  ;;  %v2286_v59 = vadd.f32 %v2285_v57, %v2284_v51  ;;  %v3247_v10 = vld [vmem:[%s3923_s3 + $0x8c] ss:$16 sps:$4 sm:$0xff]   ;;  %v3245_v11 = vld [vmem:[%s3923_s3 + $0x88] ss:$16 sps:$4 sm:$0xff]  }
 0x1ab   : > { %v2231_v19 = vadd.f32 %v2230_v16, %v2083_v15  ;;  %v2084_v22 = vmax.f32 %v1792_v18, 0.0  ;;  %v3250_v13 = vld [vmem:[%s3923_s3 + $0xac] ss:$16 sps:$4 sm:$0xff]   ;;  %v3248_v14 = vld [vmem:[%s3923_s3 + $0xa8] ss:$16 sps:$4 sm:$0xff]  }
 0x1ac   : > { %v3253_v15 = vld [vmem:[%s3923_s3 + $0xcc] ss:$16 sps:$4 sm:$0xff]   ;;  %v3251_v16 = vld [vmem:[%s3923_s3 + $0xc8] ss:$16 sps:$4 sm:$0xff]  }
 0x1ad   : > { %v2232_v26 = vadd.f32 %v2231_v19, %v2084_v22  ;;  %v3256_v18 = vld [vmem:[%s3923_s3 + $0xec] ss:$16 sps:$4 sm:$0xff]   ;;  %v3254_v19 = vld [vmem:[%s3923_s3 + $0xe8] ss:$16 sps:$4 sm:$0xff]  }
 0x1af   : > { %v2233_v53 = vadd.f32 %v2232_v26, %v2085_v23 }
 0x1b1   : > { %v2234_v32 = vadd.f32 %v2233_v53, %v2086_v28 }
 0x1b3   : > { %v2235_v37 = vadd.f32 %v2234_v32, %v2087_v31 }
 0x1b5   : > { %v2236_v40 = vadd.f32 %v2235_v37, %v2088_v35 }
 0x1b7   : > { %v2237_v20 = vadd.f32 %v2236_v40, %v2089_v38 }
 0x1b9   : > { %v2238_v44 = vadd.f32 %v2237_v20, %v2090_v41 }
 0x1bb   : > { %v2239_v25 = vrot.slane %v2238_v44, 4 }
 0x1bd   : > { %v2240_v49 = vadd.f32 %v2239_v25, %v2238_v44 }
 0x1bf   : > { %v2241_v52 = vrot.slane %v2240_v49, 2 }
 0x1c1   : > { %v2242_v55 = vadd.f32 %v2241_v52, %v2240_v49 }
 0x1c3   : > { %v2243_v2 = vrot.slane %v2242_v55, 1 }
 0x1c5   : > { %v2244_v45 = vadd.f32 %v2243_v2, %v2242_v55 }
 0x1c7   : > { %v2323_v61 = vsel %vm2322_vm5, %v2244_v45, %v2321_v12  ;;  %v3241_v12 = vld [vmem:[%s3923_s3 + $0x4c] ss:$16 sps:$4 sm:$0xff]  }
 0x1c8   : > { %v2325_v63 = vsel %vm2324_vm6, %v2265_v60, %v2323_v61 }
 0x1c9   : > { %v2327_v0 = vsel %vm2326_vm7, %v2286_v59, %v2325_v63 }
 0x1ca   : > { %v2329_v1 = vsel %vm2328_vm8, %v2307_v62, %v2327_v0 }
 0x1cb   : > { %v2337_v3 = vmul.f32 0.00390625, %v2329_v1 }
 0x1cd   : > { %v2338_v4 = vpack.c.bf16 %v2337_v3, %v2337_v3 }
 0x1cf   : > { %2564 = vmatmul.mubr.bf16.vlgmr.msra.gmra.mrb[52].mxu1 %v2338_v4 }
 0x1d0   : > { %2573 = vmatpush1.bf16.msra.mxu1 %v3233_v39  ;;  %2604 = vmatprep.mubr.bf16.mxu1 %v3298_v17  ;;  %v3242_v17 = vld [vmem:[%s3923_s3 + $0x68] ss:$16 sps:$4 sm:$0xff]  }
 0x1d1   : > { %2574 = vmatprep.subr.bf16.mxu1 %v3238_v5 }
 0x1d4   : > { %2575 = vmatpush1.bf16.msra.mxu1 %v3236_v6 }
 0x1d5   : > { %2576 = vmatprep.subr.bf16.mxu1 %v3241_v12 }
 0x1d8   : > { %2577 = vmatpush1.bf16.msra.mxu1 %v3239_v7 }
 0x1d9   : > { %2578 = vmatprep.subr.bf16.mxu1 %v3244_v9 }
 0x1dc   : > { %2579 = vmatpush1.bf16.msra.mxu1 %v3242_v17 }
 0x1dd   : > { %2580 = vmatprep.subr.bf16.mxu1 %v3247_v10 }
 0x1e0   : > { %2581 = vmatpush1.bf16.msra.mxu1 %v3245_v11 }
 0x1e1   : > { %2582 = vmatprep.subr.bf16.mxu1 %v3250_v13 }
 0x1e4   : > { %2583 = vmatpush1.bf16.msra.mxu1 %v3248_v14 }
 0x1e5   : > { %2584 = vmatprep.subr.bf16.mxu1 %v3253_v15 }
 0x1e8   : > { %2585 = vmatpush1.bf16.msra.mxu1 %v3251_v16 }
 0x1e9   : > { %2586 = vmatprep.subr.bf16.mxu1 %v3256_v18 }
 0x1ec   : > { %2587 = vmatpush1.bf16.msra.mxu1 %v3254_v19 }
 0x1ef   : > { %2605 = vmatmul.mubr.bf16.vlgmr.msra.gmra.mrb[56].mxu1 %v2338_v4 }
 0x2a2   : > { %v2565_v21 = vpop.f32.mrb[52].mxu1 }
 0x2a3   : > { %2613 = vst [vmem:[%s787_s5] sm:$0xff] %v2565_v21  ;;  %v2567_v22 = vpop.f32.mrb[53].mxu1 }
 0x2a4   : > { %2614 = vst [vmem:[%s787_s5 + $0x8] sm:$0xff] %v2567_v22  ;;  %v2569_v8 = vpop.f32.mrb[54].mxu1 }
 0x2a5   : > { %v2570_v23 = vpop.f32.mrb[55].mxu1 }
 0x2c2   : > { %v2606_v26 = vpop.f32.mrb[56].mxu1 }
 0x2c3   : > { %2615 = vst [vmem:[%s787_s5 + $0x10] sm:$0xff] %v2606_v26  ;;  %v2608_v27 = vpop.f32.mrb[57].mxu1 }
 0x2c4   : > { %2616 = vst [vmem:[%s787_s5 + $0x18] sm:$0xff] %v2608_v27  ;;  %v2610_v28 = vpop.f32.mrb[58].mxu1 }
 0x2c5   : > { %v2611_v53 = vpop.f32.mrb[59].mxu1 }
 0x2c6 PF: > { %s14_s19 = sadd.s32 1, %s3296_s19   ;;  %s3925_s15 = smov %s3284_s16 }
 0x2c7   : > { %p11_p10 = scmp.ge.s32.totalorder %s14_s19, 4   ;;  %s3926_s16 = smov %s3359_s23 }
 0x2c8   : > { %s3927_s17 = smov %s3292_s18  ;;  %s3928_s18 = smov %s3930_s20 }
 0x2c9   :  { %13 = sbr.rel (!%p11_p10) target bundleno = 3 (0x3), region = 120 }

</bundles_post_ra>
